<compile_context>
chip_gen: v5e
topology: v5e:2x2
jax: 0.10.0
libtpu: 0.0.40
codegen_flags: <defaults>
</compile_context>

<pallas_src>
import numpy as np
import jax
import jax.numpy as jnp
from jax.experimental import pallas as pl
from jax.experimental.pallas import tpu as pltpu


# ------------------------------ fused kernel --------------------------------

def _lenet5_kernel(x_ref,
                   c1w_ref, c1b_ref, r1_ref, s1_ref,
                   c2w_ref, c2b_ref, r2_ref, s2_ref,
                   f1w_ref, f1b_ref, f2w_ref, f2b_ref, f3w_ref, f3b_ref,
                   out_ref,
                   p1_ref, p2_ref):
    f32 = jnp.float32

    # ---- conv1 + bias + ReLU ------------------------------------------------
    # y1: (24, 144) ; lane = c*24 + w  (c in 0..5, w in 0..23), rows = h.
    # Valid 5x5 conv = sum over the 5 kernel-row offsets of
    #   x[h+di, :] @ banded_weight[di]   (banded matrices built on host).
    acc1 = jnp.zeros((24, 6 * 24), f32)
    for di in range(5):
        acc1 += jnp.dot(x_ref[0, di:di + 24, :], c1w_ref[di],
                        preferred_element_type=f32)
    y1 = jnp.maximum(acc1 + c1b_ref[...], 0.0)

    # ---- pool1 (2x2 / stride 2), fused as selection matmuls + max ----------
    # row pairs via R1a/R1b (12,24), lane pairs + (c,24w)->(c,12w) repack via S1a/S1b.
    hmax1 = jnp.maximum(jnp.dot(r1_ref[0], y1, preferred_element_type=f32),
                        jnp.dot(r1_ref[1], y1, preferred_element_type=f32))
    pool1 = jnp.maximum(jnp.dot(hmax1, s1_ref[0], preferred_element_type=f32),
                        jnp.dot(hmax1, s1_ref[1], preferred_element_type=f32))
    p1_ref[...] = pool1                       # (12, 72), lane = c*12 + w

    # ---- conv2 + bias + ReLU ------------------------------------------------
    # y2: (8, 128) ; lane = o*8 + w  (o in 0..15, w in 0..7).
    acc2 = jnp.zeros((8, 16 * 8), f32)
    for di in range(5):
        acc2 += jnp.dot(p1_ref[di:di + 8, :], c2w_ref[di],
                        preferred_element_type=f32)
    y2 = jnp.maximum(acc2 + c2b_ref[...], 0.0)

    # ---- pool2 --------------------------------------------------------------
    hmax2 = jnp.maximum(jnp.dot(r2_ref[0], y2, preferred_element_type=f32),
                        jnp.dot(r2_ref[1], y2, preferred_element_type=f32))
    pool2 = jnp.maximum(jnp.dot(hmax2, s2_ref[0], preferred_element_type=f32),
                        jnp.dot(hmax2, s2_ref[1], preferred_element_type=f32))
    p2_ref[...] = pool2                       # (4, 64), lane = o*4 + w, rows = h

    # ---- fc1 + ReLU ---------------------------------------------------------
    # torch flatten order (c, h, w) is folded into f1w packing; sum over the 4 rows.
    a1 = jnp.zeros((1, 120), f32)
    for h in range(4):
        a1 += jnp.dot(p2_ref[h:h + 1, :], f1w_ref[h], preferred_element_type=f32)
    a1 = jnp.maximum(a1 + f1b_ref[...], 0.0)

    # ---- fc2 + ReLU ---------------------------------------------------------
    a2 = jnp.maximum(jnp.dot(a1, f2w_ref[...], preferred_element_type=f32)
                     + f2b_ref[...], 0.0)

    # ---- fc3 (output padded to 128 lanes -> unmasked, lane-dense store) -----
    a3 = jnp.dot(a2, f3w_ref[...], preferred_element_type=f32) + f3b_ref[...]
    out_ref[0] = a3                           # (1, 128)


# ---------------------------- parameter packing ------------------------------

def init_params():
    """Plain (PyTorch-layout) LeNet-5 parameters. FC weights stored (in, out)."""
    key = jax.random.PRNGKey(0)
    ks = jax.random.split(key, 10)
    s = 0.05
    return {
        "conv1_w": s * jax.random.normal(ks[0], (6, 1, 5, 5), jnp.float32),
        "conv1_b": s * jax.random.normal(ks[1], (6,), jnp.float32),
        "conv2_w": s * jax.random.normal(ks[2], (16, 6, 5, 5), jnp.float32),
        "conv2_b": s * jax.random.normal(ks[3], (16,), jnp.float32),
        "fc1_w": s * jax.random.normal(ks[4], (16 * 4 * 4, 120), jnp.float32),
        "fc1_b": s * jax.random.normal(ks[5], (120,), jnp.float32),
        "fc2_w": s * jax.random.normal(ks[6], (120, 84), jnp.float32),
        "fc2_b": s * jax.random.normal(ks[7], (84,), jnp.float32),
        "fc3_w": s * jax.random.normal(ks[8], (84, 10), jnp.float32),
        "fc3_b": s * jax.random.normal(ks[9], (10,), jnp.float32),
    }


def pack_params(p):
    """One-time host-side repack of torch-layout params into the fused-kernel
    operands (banded conv matrices, pool selection matrices, permuted fc1,
    lane-padded fc3). Done once at init; removes all per-step layout glue."""
    c1 = np.asarray(p["conv1_w"], np.float32)          # (6, 1, 5, 5)
    c2 = np.asarray(p["conv2_w"], np.float32)          # (16, 6, 5, 5)

    # conv1 banded weights: c1w[di][w+dj, c*24+w] = K1[c,0,di,dj]
    w24 = np.arange(24)
    c1w = np.zeros((5, 28, 6 * 24), np.float32)
    for di in range(5):
        for dj in range(5):
            for c in range(6):
                c1w[di, w24 + dj, c * 24 + w24] = c1[c, 0, di, dj]
    c1b = np.zeros((1, 6 * 24), np.float32)
    for c in range(6):
        c1b[0, c * 24 + w24] = np.asarray(p["conv1_b"])[c]

    # pool1 selection matrices (rows then lanes)
    r1 = np.zeros((2, 12, 24), np.float32)
    r1[0, np.arange(12), 2 * np.arange(12)] = 1.0
    r1[1, np.arange(12), 2 * np.arange(12) + 1] = 1.0
    w12 = np.arange(12)
    s1 = np.zeros((2, 6 * 24, 6 * 12), np.float32)
    for c in range(6):
        s1[0, c * 24 + 2 * w12, c * 12 + w12] = 1.0
        s1[1, c * 24 + 2 * w12 + 1, c * 12 + w12] = 1.0

    # conv2 banded weights: c2w[di][ci*12 + w + dj, o*8 + w] = K2[o,ci,di,dj]
    w8 = np.arange(8)
    c2w = np.zeros((5, 6 * 12, 16 * 8), np.float32)
    for di in range(5):
        for dj in range(5):
            for ci in range(6):
                for o in range(16):
                    c2w[di, ci * 12 + w8 + dj, o * 8 + w8] = c2[o, ci, di, dj]
    c2b = np.zeros((1, 16 * 8), np.float32)
    for o in range(16):
        c2b[0, o * 8 + w8] = np.asarray(p["conv2_b"])[o]

    # pool2 selection matrices
    r2 = np.zeros((2, 4, 8), np.float32)
    r2[0, np.arange(4), 2 * np.arange(4)] = 1.0
    r2[1, np.arange(4), 2 * np.arange(4) + 1] = 1.0
    w4 = np.arange(4)
    s2 = np.zeros((2, 16 * 8, 16 * 4), np.float32)
    for o in range(16):
        s2[0, o * 8 + 2 * w4, o * 4 + w4] = 1.0
        s2[1, o * 8 + 2 * w4 + 1, o * 4 + w4] = 1.0

    # fc1, regrouped by pooled row h (torch flatten index = c*16 + h*4 + w)
    f1 = np.asarray(p["fc1_w"], np.float32)            # (256, 120)
    f1w = np.zeros((4, 16 * 4, 120), np.float32)
    for h in range(4):
        for o in range(16):
            for w in range(4):
                f1w[h, o * 4 + w, :] = f1[o * 16 + h * 4 + w, :]
    f1b = np.asarray(p["fc1_b"], np.float32).reshape(1, 120)

    f2w = np.asarray(p["fc2_w"], np.float32)           # (120, 84)
    f2b = np.asarray(p["fc2_b"], np.float32).reshape(1, 84)

    # fc3 zero-padded from 10 to 128 output lanes (lane-dense final store)
    f3w = np.zeros((84, 128), np.float32)
    f3w[:, :10] = np.asarray(p["fc3_w"], np.float32)
    f3b = np.zeros((1, 128), np.float32)
    f3b[0, :10] = np.asarray(p["fc3_b"], np.float32)

    return tuple(jnp.asarray(a) for a in
                 (c1w, c1b, r1, s1, c2w, c2b, r2, s2,
                  f1w, f1b, f2w, f2b, f3w, f3b))


# ------------------------------ forward wrapper ------------------------------

@jax.jit
def lenet5_forward(x, packed):
    """x: (B, 1, 28, 28) float32 NCHW -> (B, 10) logits (matches PyTorch LeNet5)."""
    B = x.shape[0]
    x2 = x.reshape(B, 28, 28)
    (c1w, c1b, r1, s1, c2w, c2b, r2, s2,
     f1w, f1b, f2w, f2b, f3w, f3b) = packed

    def resident(shape):
        nd = len(shape)
        return pl.BlockSpec(shape, lambda b, _nd=nd: (0,) * _nd)

    weights = (c1w, c1b, r1, s1, c2w, c2b, r2, s2,
               f1w, f1b, f2w, f2b, f3w, f3b)

    out = pl.pallas_call(
        _lenet5_kernel,
        out_shape=jax.ShapeDtypeStruct((B, 1, 128), jnp.float32),
        grid_spec=pltpu.PrefetchScalarGridSpec(
            num_scalar_prefetch=0,
            grid=(B,),
            in_specs=[pl.BlockSpec((1, 28, 28), lambda b: (b, 0, 0))]
                     + [resident(w.shape) for w in weights],
            out_specs=pl.BlockSpec((1, 1, 128), lambda b: (b, 0, 0)),
            scratch_shapes=[pltpu.VMEM((12, 6 * 12), jnp.float32),   # pool1
                            pltpu.VMEM((4, 16 * 4), jnp.float32)],   # pool2
        ),
        compiler_params=pltpu.CompilerParams(
            dimension_semantics=("parallel",)),
    )(x2, *weights)

    return out.reshape(B, 128)[:, :10]


# --------------------------- plain-JAX reference -----------------------------

def _reference_forward(x, p):
    """Straightforward JAX implementation of the PyTorch module (no Pallas)."""
    prec = jax.lax.Precision.HIGHEST

    def conv2d(x, w, b):
        B, C, H, W = x.shape
        Cout, Cin, k, _ = w.shape
        Ho, Wo = H - k + 1, W - k + 1
        cols = []
        for di in range(k):
            for dj in range(k):
                cols.append(x[:, :, di:di + Ho, dj:dj + Wo])
        pat = jnp.stack(cols, 0).reshape(k, k, B, C, Ho, Wo)
        pat = pat.transpose(2, 4, 5, 3, 0, 1).reshape(B * Ho * Wo, C * k * k)
        y = jnp.dot(pat, w.reshape(Cout, -1).T, precision=prec) + b
        return y.reshape(B, Ho, Wo, Cout).transpose(0, 3, 1, 2)

    def pool(x):
        return jnp.maximum(
            jnp.maximum(x[:, :, 0::2, 0::2], x[:, :, 0::2, 1::2]),
            jnp.maximum(x[:, :, 1::2, 0::2], x[:, :, 1::2, 1::2]))

    x = pool(jax.nn.relu(conv2d(x, p["conv1_w"], p["conv1_b"])))
    x = pool(jax.nn.relu(conv2d(x, p["conv2_w"], p["conv2_b"])))
    x = x.reshape(x.shape[0], -1)
    x = jax.nn.relu(jnp.dot(x, p["fc1_w"], precision=prec) + p["fc1_b"])
    x = jax.nn.relu(jnp.dot(x, p["fc2_w"], precision=prec) + p["fc2_b"])
    return jnp.dot(x, p["fc3_w"], precision=prec) + p["fc3_b"]


# ------------------------------------ main -----------------------------------

if __name__ == "__main__":
    params = init_params()
    packed = pack_params(params)

    # LeNet-5 geometry requires 28x28 inputs (so fc1 sees 16*4*4 features).
    x = jax.random.normal(jax.random.PRNGKey(0), (2, 1, 28, 28), jnp.float32)

    out = lenet5_forward(x, packed)
    out = jax.block_until_ready(out)
    assert out.shape == (2, 10) and out.dtype == jnp.float32

    ref = _reference_forward(x, params)
    err = float(jnp.max(jnp.abs(out - ref)))
    assert err < 1e-2, f"kernel/reference mismatch, max abs err = {err}"

    print("KERNEL_OK")
</pallas_src>

<mosaic_0001>
module attributes {stable_mosaic.version = 11 : i64} {
  func.func @_lenet5_kernel(%arg0: i32, %arg1: memref<1x28x28xf32, #tpu.memory_space<vmem>>, %arg2: memref<5x28x144xf32, #tpu.memory_space<vmem>>, %arg3: memref<1x144xf32, #tpu.memory_space<vmem>>, %arg4: memref<2x12x24xf32, #tpu.memory_space<vmem>>, %arg5: memref<2x144x72xf32, #tpu.memory_space<vmem>>, %arg6: memref<5x72x128xf32, #tpu.memory_space<vmem>>, %arg7: memref<1x128xf32, #tpu.memory_space<vmem>>, %arg8: memref<2x4x8xf32, #tpu.memory_space<vmem>>, %arg9: memref<2x128x64xf32, #tpu.memory_space<vmem>>, %arg10: memref<4x64x120xf32, #tpu.memory_space<vmem>>, %arg11: memref<1x120xf32, #tpu.memory_space<vmem>>, %arg12: memref<120x84xf32, #tpu.memory_space<vmem>>, %arg13: memref<1x84xf32, #tpu.memory_space<vmem>>, %arg14: memref<84x128xf32, #tpu.memory_space<vmem>>, %arg15: memref<1x128xf32, #tpu.memory_space<vmem>>, %arg16: memref<1x1x128xf32, #tpu.memory_space<vmem>>, %arg17: memref<12x72xf32, #tpu.memory_space<vmem>>, %arg18: memref<4x64xf32, #tpu.memory_space<vmem>>) attributes {dimension_semantics = [#tpu.dimension_semantics<parallel>], iteration_bounds = array<i64: 2>, scalar_prefetch = 0 : i64, scratch_operands = 2 : i64, tpu.core_type = #tpu.core_type<tc>, window_params = [{transform_indices = @transform_0, window_bounds = array<i64: 1, 28, 28>}, {pipeline_mode = #tpu.pipeline_mode<synchronous>, transform_indices = @transform_1, window_bounds = array<i64: 5, 28, 144>}, {pipeline_mode = #tpu.pipeline_mode<synchronous>, transform_indices = @transform_2, window_bounds = array<i64: 1, 144>}, {pipeline_mode = #tpu.pipeline_mode<synchronous>, transform_indices = @transform_3, window_bounds = array<i64: 2, 12, 24>}, {pipeline_mode = #tpu.pipeline_mode<synchronous>, transform_indices = @transform_4, window_bounds = array<i64: 2, 144, 72>}, {pipeline_mode = #tpu.pipeline_mode<synchronous>, transform_indices = @transform_5, window_bounds = array<i64: 5, 72, 128>}, {pipeline_mode = #tpu.pipeline_mode<synchronous>, transform_indices = @transform_6, window_bounds = array<i64: 1, 128>}, {pipeline_mode = #tpu.pipeline_mode<synchronous>, transform_indices = @transform_7, window_bounds = array<i64: 2, 4, 8>}, {pipeline_mode = #tpu.pipeline_mode<synchronous>, transform_indices = @transform_8, window_bounds = array<i64: 2, 128, 64>}, {pipeline_mode = #tpu.pipeline_mode<synchronous>, transform_indices = @transform_9, window_bounds = array<i64: 4, 64, 120>}, {pipeline_mode = #tpu.pipeline_mode<synchronous>, transform_indices = @transform_10, window_bounds = array<i64: 1, 120>}, {pipeline_mode = #tpu.pipeline_mode<synchronous>, transform_indices = @transform_11, window_bounds = array<i64: 120, 84>}, {pipeline_mode = #tpu.pipeline_mode<synchronous>, transform_indices = @transform_12, window_bounds = array<i64: 1, 84>}, {pipeline_mode = #tpu.pipeline_mode<synchronous>, transform_indices = @transform_13, window_bounds = array<i64: 84, 128>}, {pipeline_mode = #tpu.pipeline_mode<synchronous>, transform_indices = @transform_14, window_bounds = array<i64: 1, 128>}, {transform_indices = @transform_15, window_bounds = array<i64: 1, 1, 128>}]} {
    %cst = arith.constant 0.000000e+00 : f32
    %0 = vector.broadcast %cst : f32 to vector<24x144xf32>
    %c0 = arith.constant 0 : index
    %c0_0 = arith.constant 0 : index
    %c0_1 = arith.constant 0 : index
    %1 = vector.load %arg1[%c0, %c0_0, %c0_1] : memref<1x28x28xf32, #tpu.memory_space<vmem>>, vector<1x24x28xf32>
    %2 = vector.shape_cast %1 : vector<1x24x28xf32> to vector<24x28xf32>
    %c0_2 = arith.constant 0 : index
    %c0_3 = arith.constant 0 : index
    %c0_4 = arith.constant 0 : index
    %3 = vector.load %arg2[%c0_2, %c0_3, %c0_4] : memref<5x28x144xf32, #tpu.memory_space<vmem>>, vector<1x28x144xf32>
    %4 = vector.shape_cast %3 : vector<1x28x144xf32> to vector<28x144xf32>
    %cst_5 = arith.constant dense<0.000000e+00> : vector<24x144xf32>
    %5 = tpu.matmul %2, %4, %cst_5 {dimension_numbers = #tpu.dot_dimension_numbers<[1], [0], [0], [1], [0, 0, 1, 1], [], []>} : vector<24x28xf32>, vector<28x144xf32>, vector<24x144xf32> -> vector<24x144xf32>
    %6 = arith.addf %0, %5 : vector<24x144xf32>
    %c0_6 = arith.constant 0 : index
    %c1 = arith.constant 1 : index
    %c0_7 = arith.constant 0 : index
    %7 = vector.load %arg1[%c0_6, %c1, %c0_7] : memref<1x28x28xf32, #tpu.memory_space<vmem>>, vector<1x24x28xf32>
    %8 = vector.shape_cast %7 : vector<1x24x28xf32> to vector<24x28xf32>
    %c1_8 = arith.constant 1 : index
    %c0_9 = arith.constant 0 : index
    %c0_10 = arith.constant 0 : index
    %9 = vector.load %arg2[%c1_8, %c0_9, %c0_10] : memref<5x28x144xf32, #tpu.memory_space<vmem>>, vector<1x28x144xf32>
    %10 = vector.shape_cast %9 : vector<1x28x144xf32> to vector<28x144xf32>
    %cst_11 = arith.constant dense<0.000000e+00> : vector<24x144xf32>
    %11 = tpu.matmul %8, %10, %cst_11 {dimension_numbers = #tpu.dot_dimension_numbers<[1], [0], [0], [1], [0, 0, 1, 1], [], []>} : vector<24x28xf32>, vector<28x144xf32>, vector<24x144xf32> -> vector<24x144xf32>
    %12 = arith.addf %6, %11 : vector<24x144xf32>
    %c0_12 = arith.constant 0 : index
    %c2 = arith.constant 2 : index
    %c0_13 = arith.constant 0 : index
    %13 = vector.load %arg1[%c0_12, %c2, %c0_13] : memref<1x28x28xf32, #tpu.memory_space<vmem>>, vector<1x24x28xf32>
    %14 = vector.shape_cast %13 : vector<1x24x28xf32> to vector<24x28xf32>
    %c2_14 = arith.constant 2 : index
    %c0_15 = arith.constant 0 : index
    %c0_16 = arith.constant 0 : index
    %15 = vector.load %arg2[%c2_14, %c0_15, %c0_16] : memref<5x28x144xf32, #tpu.memory_space<vmem>>, vector<1x28x144xf32>
    %16 = vector.shape_cast %15 : vector<1x28x144xf32> to vector<28x144xf32>
    %cst_17 = arith.constant dense<0.000000e+00> : vector<24x144xf32>
    %17 = tpu.matmul %14, %16, %cst_17 {dimension_numbers = #tpu.dot_dimension_numbers<[1], [0], [0], [1], [0, 0, 1, 1], [], []>} : vector<24x28xf32>, vector<28x144xf32>, vector<24x144xf32> -> vector<24x144xf32>
    %18 = arith.addf %12, %17 : vector<24x144xf32>
    %c0_18 = arith.constant 0 : index
    %c3 = arith.constant 3 : index
    %c0_19 = arith.constant 0 : index
    %19 = vector.load %arg1[%c0_18, %c3, %c0_19] : memref<1x28x28xf32, #tpu.memory_space<vmem>>, vector<1x24x28xf32>
    %20 = vector.shape_cast %19 : vector<1x24x28xf32> to vector<24x28xf32>
    %c3_20 = arith.constant 3 : index
    %c0_21 = arith.constant 0 : index
    %c0_22 = arith.constant 0 : index
    %21 = vector.load %arg2[%c3_20, %c0_21, %c0_22] : memref<5x28x144xf32, #tpu.memory_space<vmem>>, vector<1x28x144xf32>
    %22 = vector.shape_cast %21 : vector<1x28x144xf32> to vector<28x144xf32>
    %cst_23 = arith.constant dense<0.000000e+00> : vector<24x144xf32>
    %23 = tpu.matmul %20, %22, %cst_23 {dimension_numbers = #tpu.dot_dimension_numbers<[1], [0], [0], [1], [0, 0, 1, 1], [], []>} : vector<24x28xf32>, vector<28x144xf32>, vector<24x144xf32> -> vector<24x144xf32>
    %24 = arith.addf %18, %23 : vector<24x144xf32>
    %c0_24 = arith.constant 0 : index
    %c4 = arith.constant 4 : index
    %c0_25 = arith.constant 0 : index
    %25 = vector.load %arg1[%c0_24, %c4, %c0_25] : memref<1x28x28xf32, #tpu.memory_space<vmem>>, vector<1x24x28xf32>
    %26 = vector.shape_cast %25 : vector<1x24x28xf32> to vector<24x28xf32>
    %c4_26 = arith.constant 4 : index
    %c0_27 = arith.constant 0 : index
    %c0_28 = arith.constant 0 : index
    %27 = vector.load %arg2[%c4_26, %c0_27, %c0_28] : memref<5x28x144xf32, #tpu.memory_space<vmem>>, vector<1x28x144xf32>
    %28 = vector.shape_cast %27 : vector<1x28x144xf32> to vector<28x144xf32>
    %cst_29 = arith.constant dense<0.000000e+00> : vector<24x144xf32>
    %29 = tpu.matmul %26, %28, %cst_29 {dimension_numbers = #tpu.dot_dimension_numbers<[1], [0], [0], [1], [0, 0, 1, 1], [], []>} : vector<24x28xf32>, vector<28x144xf32>, vector<24x144xf32> -> vector<24x144xf32>
    %30 = arith.addf %24, %29 : vector<24x144xf32>
    %c0_30 = arith.constant 0 : index
    %c0_31 = arith.constant 0 : index
    %31 = vector.load %arg3[%c0_30, %c0_31] : memref<1x144xf32, #tpu.memory_space<vmem>>, vector<1x144xf32>
    %32 = vector.broadcast %31 : vector<1x144xf32> to vector<24x144xf32>
    %33 = arith.addf %30, %32 : vector<24x144xf32>
    %cst_32 = arith.constant 0.000000e+00 : f32
    %34 = vector.broadcast %cst_32 : f32 to vector<24x144xf32>
    %35 = arith.maximumf %33, %34 : vector<24x144xf32>
    %c0_33 = arith.constant 0 : index
    %c0_34 = arith.constant 0 : index
    %c0_35 = arith.constant 0 : index
    %36 = vector.load %arg4[%c0_33, %c0_34, %c0_35] : memref<2x12x24xf32, #tpu.memory_space<vmem>>, vector<1x12x24xf32>
    %37 = vector.shape_cast %36 : vector<1x12x24xf32> to vector<12x24xf32>
    %cst_36 = arith.constant dense<0.000000e+00> : vector<12x144xf32>
    %38 = tpu.matmul %37, %35, %cst_36 {dimension_numbers = #tpu.dot_dimension_numbers<[1], [0], [0], [1], [0, 0, 1, 1], [], []>} : vector<12x24xf32>, vector<24x144xf32>, vector<12x144xf32> -> vector<12x144xf32>
    %c1_37 = arith.constant 1 : index
    %c0_38 = arith.constant 0 : index
    %c0_39 = arith.constant 0 : index
    %39 = vector.load %arg4[%c1_37, %c0_38, %c0_39] : memref<2x12x24xf32, #tpu.memory_space<vmem>>, vector<1x12x24xf32>
    %40 = vector.shape_cast %39 : vector<1x12x24xf32> to vector<12x24xf32>
    %cst_40 = arith.constant dense<0.000000e+00> : vector<12x144xf32>
    %41 = tpu.matmul %40, %35, %cst_40 {dimension_numbers = #tpu.dot_dimension_numbers<[1], [0], [0], [1], [0, 0, 1, 1], [], []>} : vector<12x24xf32>, vector<24x144xf32>, vector<12x144xf32> -> vector<12x144xf32>
    %42 = arith.maximumf %38, %41 : vector<12x144xf32>
    %c0_41 = arith.constant 0 : index
    %c0_42 = arith.constant 0 : index
    %c0_43 = arith.constant 0 : index
    %43 = vector.load %arg5[%c0_41, %c0_42, %c0_43] : memref<2x144x72xf32, #tpu.memory_space<vmem>>, vector<1x144x72xf32>
    %44 = vector.shape_cast %43 : vector<1x144x72xf32> to vector<144x72xf32>
    %cst_44 = arith.constant dense<0.000000e+00> : vector<12x72xf32>
    %45 = tpu.matmul %42, %44, %cst_44 {dimension_numbers = #tpu.dot_dimension_numbers<[1], [0], [0], [1], [0, 0, 1, 1], [], []>} : vector<12x144xf32>, vector<144x72xf32>, vector<12x72xf32> -> vector<12x72xf32>
    %c1_45 = arith.constant 1 : index
    %c0_46 = arith.constant 0 : index
    %c0_47 = arith.constant 0 : index
    %46 = vector.load %arg5[%c1_45, %c0_46, %c0_47] : memref<2x144x72xf32, #tpu.memory_space<vmem>>, vector<1x144x72xf32>
    %47 = vector.shape_cast %46 : vector<1x144x72xf32> to vector<144x72xf32>
    %cst_48 = arith.constant dense<0.000000e+00> : vector<12x72xf32>
    %48 = tpu.matmul %42, %47, %cst_48 {dimension_numbers = #tpu.dot_dimension_numbers<[1], [0], [0], [1], [0, 0, 1, 1], [], []>} : vector<12x144xf32>, vector<144x72xf32>, vector<12x72xf32> -> vector<12x72xf32>
    %49 = arith.maximumf %45, %48 : vector<12x72xf32>
    %c0_49 = arith.constant 0 : index
    %c0_50 = arith.constant 0 : index
    %50 = vector.load %arg17[%c0_49, %c0_50] : memref<12x72xf32, #tpu.memory_space<vmem>>, vector<12x72xf32>
    tpu.vector_store %arg17[%c0_49, %c0_50], %49 {strides = array<i32>} : memref<12x72xf32, #tpu.memory_space<vmem>>, vector<12x72xf32>,
    %cst_51 = arith.constant 0.000000e+00 : f32
    %51 = vector.broadcast %cst_51 : f32 to vector<8x128xf32>
    %c0_52 = arith.constant 0 : index
    %c0_53 = arith.constant 0 : index
    %52 = vector.load %arg17[%c0_52, %c0_53] : memref<12x72xf32, #tpu.memory_space<vmem>>, vector<8x72xf32>
    %c0_54 = arith.constant 0 : index
    %c0_55 = arith.constant 0 : index
    %c0_56 = arith.constant 0 : index
    %53 = vector.load %arg6[%c0_54, %c0_55, %c0_56] : memref<5x72x128xf32, #tpu.memory_space<vmem>>, vector<1x72x128xf32>
    %54 = vector.shape_cast %53 : vector<1x72x128xf32> to vector<72x128xf32>
    %cst_57 = arith.constant dense<0.000000e+00> : vector<8x128xf32>
    %55 = tpu.matmul %52, %54, %cst_57 {dimension_numbers = #tpu.dot_dimension_numbers<[1], [0], [0], [1], [0, 0, 1, 1], [], []>} : vector<8x72xf32>, vector<72x128xf32>, vector<8x128xf32> -> vector<8x128xf32>
    %56 = arith.addf %51, %55 : vector<8x128xf32>
    %c1_58 = arith.constant 1 : index
    %c0_59 = arith.constant 0 : index
    %57 = vector.load %arg17[%c1_58, %c0_59] : memref<12x72xf32, #tpu.memory_space<vmem>>, vector<8x72xf32>
    %c1_60 = arith.constant 1 : index
    %c0_61 = arith.constant 0 : index
    %c0_62 = arith.constant 0 : index
    %58 = vector.load %arg6[%c1_60, %c0_61, %c0_62] : memref<5x72x128xf32, #tpu.memory_space<vmem>>, vector<1x72x128xf32>
    %59 = vector.shape_cast %58 : vector<1x72x128xf32> to vector<72x128xf32>
    %cst_63 = arith.constant dense<0.000000e+00> : vector<8x128xf32>
    %60 = tpu.matmul %57, %59, %cst_63 {dimension_numbers = #tpu.dot_dimension_numbers<[1], [0], [0], [1], [0, 0, 1, 1], [], []>} : vector<8x72xf32>, vector<72x128xf32>, vector<8x128xf32> -> vector<8x128xf32>
    %61 = arith.addf %56, %60 : vector<8x128xf32>
    %c2_64 = arith.constant 2 : index
    %c0_65 = arith.constant 0 : index
    %62 = vector.load %arg17[%c2_64, %c0_65] : memref<12x72xf32, #tpu.memory_space<vmem>>, vector<8x72xf32>
    %c2_66 = arith.constant 2 : index
    %c0_67 = arith.constant 0 : index
    %c0_68 = arith.constant 0 : index
    %63 = vector.load %arg6[%c2_66, %c0_67, %c0_68] : memref<5x72x128xf32, #tpu.memory_space<vmem>>, vector<1x72x128xf32>
    %64 = vector.shape_cast %63 : vector<1x72x128xf32> to vector<72x128xf32>
    %cst_69 = arith.constant dense<0.000000e+00> : vector<8x128xf32>
    %65 = tpu.matmul %62, %64, %cst_69 {dimension_numbers = #tpu.dot_dimension_numbers<[1], [0], [0], [1], [0, 0, 1, 1], [], []>} : vector<8x72xf32>, vector<72x128xf32>, vector<8x128xf32> -> vector<8x128xf32>
    %66 = arith.addf %61, %65 : vector<8x128xf32>
    %c3_70 = arith.constant 3 : index
    %c0_71 = arith.constant 0 : index
    %67 = vector.load %arg17[%c3_70, %c0_71] : memref<12x72xf32, #tpu.memory_space<vmem>>, vector<8x72xf32>
    %c3_72 = arith.constant 3 : index
    %c0_73 = arith.constant 0 : index
    %c0_74 = arith.constant 0 : index
    %68 = vector.load %arg6[%c3_72, %c0_73, %c0_74] : memref<5x72x128xf32, #tpu.memory_space<vmem>>, vector<1x72x128xf32>
    %69 = vector.shape_cast %68 : vector<1x72x128xf32> to vector<72x128xf32>
    %cst_75 = arith.constant dense<0.000000e+00> : vector<8x128xf32>
    %70 = tpu.matmul %67, %69, %cst_75 {dimension_numbers = #tpu.dot_dimension_numbers<[1], [0], [0], [1], [0, 0, 1, 1], [], []>} : vector<8x72xf32>, vector<72x128xf32>, vector<8x128xf32> -> vector<8x128xf32>
    %71 = arith.addf %66, %70 : vector<8x128xf32>
    %c4_76 = arith.constant 4 : index
    %c0_77 = arith.constant 0 : index
    %72 = vector.load %arg17[%c4_76, %c0_77] : memref<12x72xf32, #tpu.memory_space<vmem>>, vector<8x72xf32>
    %c4_78 = arith.constant 4 : index
    %c0_79 = arith.constant 0 : index
    %c0_80 = arith.constant 0 : index
    %73 = vector.load %arg6[%c4_78, %c0_79, %c0_80] : memref<5x72x128xf32, #tpu.memory_space<vmem>>, vector<1x72x128xf32>
    %74 = vector.shape_cast %73 : vector<1x72x128xf32> to vector<72x128xf32>
    %cst_81 = arith.constant dense<0.000000e+00> : vector<8x128xf32>
    %75 = tpu.matmul %72, %74, %cst_81 {dimension_numbers = #tpu.dot_dimension_numbers<[1], [0], [0], [1], [0, 0, 1, 1], [], []>} : vector<8x72xf32>, vector<72x128xf32>, vector<8x128xf32> -> vector<8x128xf32>
    %76 = arith.addf %71, %75 : vector<8x128xf32>
    %c0_82 = arith.constant 0 : index
    %c0_83 = arith.constant 0 : index
    %77 = vector.load %arg7[%c0_82, %c0_83] : memref<1x128xf32, #tpu.memory_space<vmem>>, vector<1x128xf32>
    %78 = vector.broadcast %77 : vector<1x128xf32> to vector<8x128xf32>
    %79 = arith.addf %76, %78 : vector<8x128xf32>
    %cst_84 = arith.constant 0.000000e+00 : f32
    %80 = vector.broadcast %cst_84 : f32 to vector<8x128xf32>
    %81 = arith.maximumf %79, %80 : vector<8x128xf32>
    %c0_85 = arith.constant 0 : index
    %c0_86 = arith.constant 0 : index
    %c0_87 = arith.constant 0 : index
    %82 = vector.load %arg8[%c0_85, %c0_86, %c0_87] : memref<2x4x8xf32, #tpu.memory_space<vmem>>, vector<1x4x8xf32>
    %83 = vector.shape_cast %82 : vector<1x4x8xf32> to vector<4x8xf32>
    %cst_88 = arith.constant dense<0.000000e+00> : vector<4x128xf32>
    %84 = tpu.matmul %83, %81, %cst_88 {dimension_numbers = #tpu.dot_dimension_numbers<[1], [0], [0], [1], [0, 0, 1, 1], [], []>} : vector<4x8xf32>, vector<8x128xf32>, vector<4x128xf32> -> vector<4x128xf32>
    %c1_89 = arith.constant 1 : index
    %c0_90 = arith.constant 0 : index
    %c0_91 = arith.constant 0 : index
    %85 = vector.load %arg8[%c1_89, %c0_90, %c0_91] : memref<2x4x8xf32, #tpu.memory_space<vmem>>, vector<1x4x8xf32>
    %86 = vector.shape_cast %85 : vector<1x4x8xf32> to vector<4x8xf32>
    %cst_92 = arith.constant dense<0.000000e+00> : vector<4x128xf32>
    %87 = tpu.matmul %86, %81, %cst_92 {dimension_numbers = #tpu.dot_dimension_numbers<[1], [0], [0], [1], [0, 0, 1, 1], [], []>} : vector<4x8xf32>, vector<8x128xf32>, vector<4x128xf32> -> vector<4x128xf32>
    %88 = arith.maximumf %84, %87 : vector<4x128xf32>
    %c0_93 = arith.constant 0 : index
    %c0_94 = arith.constant 0 : index
    %c0_95 = arith.constant 0 : index
    %89 = vector.load %arg9[%c0_93, %c0_94, %c0_95] : memref<2x128x64xf32, #tpu.memory_space<vmem>>, vector<1x128x64xf32>
    %90 = vector.shape_cast %89 : vector<1x128x64xf32> to vector<128x64xf32>
    %cst_96 = arith.constant dense<0.000000e+00> : vector<4x64xf32>
    %91 = tpu.matmul %88, %90, %cst_96 {dimension_numbers = #tpu.dot_dimension_numbers<[1], [0], [0], [1], [0, 0, 1, 1], [], []>} : vector<4x128xf32>, vector<128x64xf32>, vector<4x64xf32> -> vector<4x64xf32>
    %c1_97 = arith.constant 1 : index
    %c0_98 = arith.constant 0 : index
    %c0_99 = arith.constant 0 : index
    %92 = vector.load %arg9[%c1_97, %c0_98, %c0_99] : memref<2x128x64xf32, #tpu.memory_space<vmem>>, vector<1x128x64xf32>
    %93 = vector.shape_cast %92 : vector<1x128x64xf32> to vector<128x64xf32>
    %cst_100 = arith.constant dense<0.000000e+00> : vector<4x64xf32>
    %94 = tpu.matmul %88, %93, %cst_100 {dimension_numbers = #tpu.dot_dimension_numbers<[1], [0], [0], [1], [0, 0, 1, 1], [], []>} : vector<4x128xf32>, vector<128x64xf32>, vector<4x64xf32> -> vector<4x64xf32>
    %95 = arith.maximumf %91, %94 : vector<4x64xf32>
    %c0_101 = arith.constant 0 : index
    %c0_102 = arith.constant 0 : index
    %96 = vector.load %arg18[%c0_101, %c0_102] : memref<4x64xf32, #tpu.memory_space<vmem>>, vector<4x64xf32>
    tpu.vector_store %arg18[%c0_101, %c0_102], %95 {strides = array<i32>} : memref<4x64xf32, #tpu.memory_space<vmem>>, vector<4x64xf32>,
    %cst_103 = arith.constant 0.000000e+00 : f32
    %97 = vector.broadcast %cst_103 : f32 to vector<1x120xf32>
    %c0_104 = arith.constant 0 : index
    %c0_105 = arith.constant 0 : index
    %98 = vector.load %arg18[%c0_104, %c0_105] : memref<4x64xf32, #tpu.memory_space<vmem>>, vector<1x64xf32>
    %c0_106 = arith.constant 0 : index
    %c0_107 = arith.constant 0 : index
    %c0_108 = arith.constant 0 : index
    %99 = vector.load %arg10[%c0_106, %c0_107, %c0_108] : memref<4x64x120xf32, #tpu.memory_space<vmem>>, vector<1x64x120xf32>
    %100 = vector.shape_cast %99 : vector<1x64x120xf32> to vector<64x120xf32>
    %cst_109 = arith.constant dense<0.000000e+00> : vector<1x120xf32>
    %101 = tpu.matmul %98, %100, %cst_109 {dimension_numbers = #tpu.dot_dimension_numbers<[1], [0], [0], [1], [0, 0, 1, 1], [], []>} : vector<1x64xf32>, vector<64x120xf32>, vector<1x120xf32> -> vector<1x120xf32>
    %102 = arith.addf %97, %101 : vector<1x120xf32>
    %c1_110 = arith.constant 1 : index
    %c0_111 = arith.constant 0 : index
    %103 = vector.load %arg18[%c1_110, %c0_111] : memref<4x64xf32, #tpu.memory_space<vmem>>, vector<1x64xf32>
    %c1_112 = arith.constant 1 : index
    %c0_113 = arith.constant 0 : index
    %c0_114 = arith.constant 0 : index
    %104 = vector.load %arg10[%c1_112, %c0_113, %c0_114] : memref<4x64x120xf32, #tpu.memory_space<vmem>>, vector<1x64x120xf32>
    %105 = vector.shape_cast %104 : vector<1x64x120xf32> to vector<64x120xf32>
    %cst_115 = arith.constant dense<0.000000e+00> : vector<1x120xf32>
    %106 = tpu.matmul %103, %105, %cst_115 {dimension_numbers = #tpu.dot_dimension_numbers<[1], [0], [0], [1], [0, 0, 1, 1], [], []>} : vector<1x64xf32>, vector<64x120xf32>, vector<1x120xf32> -> vector<1x120xf32>
    %107 = arith.addf %102, %106 : vector<1x120xf32>
    %c2_116 = arith.constant 2 : index
    %c0_117 = arith.constant 0 : index
    %108 = vector.load %arg18[%c2_116, %c0_117] : memref<4x64xf32, #tpu.memory_space<vmem>>, vector<1x64xf32>
    %c2_118 = arith.constant 2 : index
    %c0_119 = arith.constant 0 : index
    %c0_120 = arith.constant 0 : index
    %109 = vector.load %arg10[%c2_118, %c0_119, %c0_120] : memref<4x64x120xf32, #tpu.memory_space<vmem>>, vector<1x64x120xf32>
    %110 = vector.shape_cast %109 : vector<1x64x120xf32> to vector<64x120xf32>
    %cst_121 = arith.constant dense<0.000000e+00> : vector<1x120xf32>
    %111 = tpu.matmul %108, %110, %cst_121 {dimension_numbers = #tpu.dot_dimension_numbers<[1], [0], [0], [1], [0, 0, 1, 1], [], []>} : vector<1x64xf32>, vector<64x120xf32>, vector<1x120xf32> -> vector<1x120xf32>
    %112 = arith.addf %107, %111 : vector<1x120xf32>
    %c3_122 = arith.constant 3 : index
    %c0_123 = arith.constant 0 : index
    %113 = vector.load %arg18[%c3_122, %c0_123] : memref<4x64xf32, #tpu.memory_space<vmem>>, vector<1x64xf32>
    %c3_124 = arith.constant 3 : index
    %c0_125 = arith.constant 0 : index
    %c0_126 = arith.constant 0 : index
    %114 = vector.load %arg10[%c3_124, %c0_125, %c0_126] : memref<4x64x120xf32, #tpu.memory_space<vmem>>, vector<1x64x120xf32>
    %115 = vector.shape_cast %114 : vector<1x64x120xf32> to vector<64x120xf32>
    %cst_127 = arith.constant dense<0.000000e+00> : vector<1x120xf32>
    %116 = tpu.matmul %113, %115, %cst_127 {dimension_numbers = #tpu.dot_dimension_numbers<[1], [0], [0], [1], [0, 0, 1, 1], [], []>} : vector<1x64xf32>, vector<64x120xf32>, vector<1x120xf32> -> vector<1x120xf32>
    %117 = arith.addf %112, %116 : vector<1x120xf32>
    %c0_128 = arith.constant 0 : index
    %c0_129 = arith.constant 0 : index
    %118 = vector.load %arg11[%c0_128, %c0_129] : memref<1x120xf32, #tpu.memory_space<vmem>>, vector<1x120xf32>
    %119 = arith.addf %117, %118 : vector<1x120xf32>
    %cst_130 = arith.constant 0.000000e+00 : f32
    %120 = vector.broadcast %cst_130 : f32 to vector<1x120xf32>
    %121 = arith.maximumf %119, %120 : vector<1x120xf32>
    %c0_131 = arith.constant 0 : index
    %c0_132 = arith.constant 0 : index
    %122 = vector.load %arg12[%c0_131, %c0_132] : memref<120x84xf32, #tpu.memory_space<vmem>>, vector<120x84xf32>
    %cst_133 = arith.constant dense<0.000000e+00> : vector<1x84xf32>
    %123 = tpu.matmul %121, %122, %cst_133 {dimension_numbers = #tpu.dot_dimension_numbers<[1], [0], [0], [1], [0, 0, 1, 1], [], []>} : vector<1x120xf32>, vector<120x84xf32>, vector<1x84xf32> -> vector<1x84xf32>
    %c0_134 = arith.constant 0 : index
    %c0_135 = arith.constant 0 : index
    %124 = vector.load %arg13[%c0_134, %c0_135] : memref<1x84xf32, #tpu.memory_space<vmem>>, vector<1x84xf32>
    %125 = arith.addf %123, %124 : vector<1x84xf32>
    %cst_136 = arith.constant 0.000000e+00 : f32
    %126 = vector.broadcast %cst_136 : f32 to vector<1x84xf32>
    %127 = arith.maximumf %125, %126 : vector<1x84xf32>
    %c0_137 = arith.constant 0 : index
    %c0_138 = arith.constant 0 : index
    %128 = vector.load %arg14[%c0_137, %c0_138] : memref<84x128xf32, #tpu.memory_space<vmem>>, vector<84x128xf32>
    %cst_139 = arith.constant dense<0.000000e+00> : vector<1x128xf32>
    %129 = tpu.matmul %127, %128, %cst_139 {dimension_numbers = #tpu.dot_dimension_numbers<[1], [0], [0], [1], [0, 0, 1, 1], [], []>} : vector<1x84xf32>, vector<84x128xf32>, vector<1x128xf32> -> vector<1x128xf32>
    %c0_140 = arith.constant 0 : index
    %c0_141 = arith.constant 0 : index
    %130 = vector.load %arg15[%c0_140, %c0_141] : memref<1x128xf32, #tpu.memory_space<vmem>>, vector<1x128xf32>
    %131 = arith.addf %129, %130 : vector<1x128xf32>
    %c0_142 = arith.constant 0 : index
    %c0_143 = arith.constant 0 : index
    %c0_144 = arith.constant 0 : index
    %132 = vector.load %arg16[%c0_142, %c0_143, %c0_144] : memref<1x1x128xf32, #tpu.memory_space<vmem>>, vector<1x1x128xf32>
    %133 = vector.shape_cast %132 : vector<1x1x128xf32> to vector<1x128xf32>
    %134 = vector.shape_cast %131 : vector<1x128xf32> to vector<1x1x128xf32>
    tpu.vector_store %arg16[%c0_142, %c0_143, %c0_144], %134 {strides = array<i32>} : memref<1x1x128xf32, #tpu.memory_space<vmem>>, vector<1x1x128xf32>,
    return
  }
  func.func @transform_0(%arg0: i32) -> (i32, i32, i32) {
    %c0_i32 = arith.constant 0 : i32
    %c0_i32_0 = arith.constant 0 : i32
    %c0_i32_1 = arith.constant 0 : i32
    return %arg0, %c0_i32, %c0_i32_0 : i32, i32, i32
  }
  func.func @transform_1(%arg0: i32) -> (i32, i32, i32) {
    %c0_i32 = arith.constant 0 : i32
    %c0_i32_0 = arith.constant 0 : i32
    %c0_i32_1 = arith.constant 0 : i32
    %c0_i32_2 = arith.constant 0 : i32
    return %c0_i32, %c0_i32_0, %c0_i32_1 : i32, i32, i32
  }
  func.func @transform_2(%arg0: i32) -> (i32, i32) {
    %c0_i32 = arith.constant 0 : i32
    %c0_i32_0 = arith.constant 0 : i32
    %c0_i32_1 = arith.constant 0 : i32
    return %c0_i32, %c0_i32_0 : i32, i32
  }
  func.func @transform_3(%arg0: i32) -> (i32, i32, i32) {
    %c0_i32 = arith.constant 0 : i32
    %c0_i32_0 = arith.constant 0 : i32
    %c0_i32_1 = arith.constant 0 : i32
    %c0_i32_2 = arith.constant 0 : i32
    return %c0_i32, %c0_i32_0, %c0_i32_1 : i32, i32, i32
  }
  func.func @transform_4(%arg0: i32) -> (i32, i32, i32) {
    %c0_i32 = arith.constant 0 : i32
    %c0_i32_0 = arith.constant 0 : i32
    %c0_i32_1 = arith.constant 0 : i32
    %c0_i32_2 = arith.constant 0 : i32
    return %c0_i32, %c0_i32_0, %c0_i32_1 : i32, i32, i32
  }
  func.func @transform_5(%arg0: i32) -> (i32, i32, i32) {
    %c0_i32 = arith.constant 0 : i32
    %c0_i32_0 = arith.constant 0 : i32
    %c0_i32_1 = arith.constant 0 : i32
    %c0_i32_2 = arith.constant 0 : i32
    return %c0_i32, %c0_i32_0, %c0_i32_1 : i32, i32, i32
  }
  func.func @transform_6(%arg0: i32) -> (i32, i32) {
    %c0_i32 = arith.constant 0 : i32
    %c0_i32_0 = arith.constant 0 : i32
    %c0_i32_1 = arith.constant 0 : i32
    return %c0_i32, %c0_i32_0 : i32, i32
  }
  func.func @transform_7(%arg0: i32) -> (i32, i32, i32) {
    %c0_i32 = arith.constant 0 : i32
    %c0_i32_0 = arith.constant 0 : i32
    %c0_i32_1 = arith.constant 0 : i32
    %c0_i32_2 = arith.constant 0 : i32
    return %c0_i32, %c0_i32_0, %c0_i32_1 : i32, i32, i32
  }
  func.func @transform_8(%arg0: i32) -> (i32, i32, i32) {
    %c0_i32 = arith.constant 0 : i32
    %c0_i32_0 = arith.constant 0 : i32
    %c0_i32_1 = arith.constant 0 : i32
    %c0_i32_2 = arith.constant 0 : i32
    return %c0_i32, %c0_i32_0, %c0_i32_1 : i32, i32, i32
  }
  func.func @transform_9(%arg0: i32) -> (i32, i32, i32) {
    %c0_i32 = arith.constant 0 : i32
    %c0_i32_0 = arith.constant 0 : i32
    %c0_i32_1 = arith.constant 0 : i32
    %c0_i32_2 = arith.constant 0 : i32
    return %c0_i32, %c0_i32_0, %c0_i32_1 : i32, i32, i32
  }
  func.func @transform_10(%arg0: i32) -> (i32, i32) {
    %c0_i32 = arith.constant 0 : i32
    %c0_i32_0 = arith.constant 0 : i32
    %c0_i32_1 = arith.constant 0 : i32
    return %c0_i32, %c0_i32_0 : i32, i32
  }
  func.func @transform_11(%arg0: i32) -> (i32, i32) {
    %c0_i32 = arith.constant 0 : i32
    %c0_i32_0 = arith.constant 0 : i32
    %c0_i32_1 = arith.constant 0 : i32
    return %c0_i32, %c0_i32_0 : i32, i32
  }
  func.func @transform_12(%arg0: i32) -> (i32, i32) {
    %c0_i32 = arith.constant 0 : i32
    %c0_i32_0 = arith.constant 0 : i32
    %c0_i32_1 = arith.constant 0 : i32
    return %c0_i32, %c0_i32_0 : i32, i32
  }
  func.func @transform_13(%arg0: i32) -> (i32, i32) {
    %c0_i32 = arith.constant 0 : i32
    %c0_i32_0 = arith.constant 0 : i32
    %c0_i32_1 = arith.constant 0 : i32
    return %c0_i32, %c0_i32_0 : i32, i32
  }
  func.func @transform_14(%arg0: i32) -> (i32, i32) {
    %c0_i32 = arith.constant 0 : i32
    %c0_i32_0 = arith.constant 0 : i32
    %c0_i32_1 = arith.constant 0 : i32
    return %c0_i32, %c0_i32_0 : i32, i32
  }
  func.func @transform_15(%arg0: i32) -> (i32, i32, i32) {
    %c0_i32 = arith.constant 0 : i32
    %c0_i32_0 = arith.constant 0 : i32
    %c0_i32_1 = arith.constant 0 : i32
    return %arg0, %c0_i32, %c0_i32_0 : i32, i32, i32
  }
}

</mosaic_0001>

<bundles_post_ra>
// kernel: lenet5_forward.1
= control target key start
LH: loop header
LB: loop body
LE: loop exit
PB: predicated region body
PF: predicated region fallthrough
CT: control target
= control target key end

     0   :  { %s2869_s0 = inlined_call_operand.vmem [shape: f32[2,28,28], index: 0, kind: input, shape index: {}]   ;;  %s2870_s1 = inlined_call_operand.hbm [shape: f32[5,28,144], index: 1, kind: input, shape index: {}]   ;;  %s2871_s2 = inlined_call_operand.vmem [shape: f32[1,144], index: 2, kind: input, shape index: {}]   ;;  %s2872_s3 = inlined_call_operand.vmem [shape: f32[2,12,24], index: 3, kind: input, shape index: {}]   ;;  %s2873_s4 = inlined_call_operand.hbm [shape: f32[2,144,72], index: 4, kind: input, shape index: {}]   ;;  %s2874_s5 = inlined_call_operand.vmem [shape: f32[5,72,128], index: 5, kind: input, shape index: {}]   ;;  %s2875_s6 = inlined_call_operand.vmem [shape: f32[1,128], index: 6, kind: input, shape index: {}]   ;;  %s2876_s7 = inlined_call_operand.vmem [shape: f32[2,4,8], index: 7, kind: input, shape index: {}]   ;;  %s2877_s8 = inlined_call_operand.vmem [shape: f32[2,128,64], index: 8, kind: input, shape index: {}]   ;;  %s2878_s9 = inlined_call_operand.hbm [shape: f32[4,64,120], index: 9, kind: input, shape index: {}]   ;;  %s2879_s10 = inlined_call_operand.vmem [shape: f32[1,120], index: 10, kind: input, shape index: {}]   ;;  %s2880_s11 = inlined_call_operand.vmem [shape: f32[120,84], index: 11, kind: input, shape index: {}]   ;;  %s2881_s12 = inlined_call_operand.vmem [shape: f32[1,84], index: 12, kind: input, shape index: {}]   ;;  %s2882_s13 = inlined_call_operand.vmem [shape: f32[84,128], index: 13, kind: input, shape index: {}]   ;;  %s2883_s14 = inlined_call_operand.vmem [shape: f32[1,128], index: 14, kind: input, shape index: {}]   ;;  %s2884_s15 = inlined_call_operand.hbm [shape: f32[2,1,128], index: 15, kind: output, shape index: {}]  }
   0x1   :  { %2893 = sst [smem:[#allocation21_spill]] %s2870_s1 }
   0x2   :  { %2894 = sst [smem:[#allocation22_spill]] %s2873_s4 }
   0x3   :  { %2895 = sst [smem:[#allocation23_spill]] %s2883_s14 }
   0x4   :  { %20 = vsyncpa [#allocation5], 0 }
   0x5   :  { %21 = vsyncpa [#allocation8], 0 }
   0x6   :  { %22 = vsyncpa [#allocation6], 0 }
   0x7   :  { %24 = vsyncpa [#allocation6 + $0x1], 0  ;;  %s2319_s18 = smov 0   ;;  %s2321_s19 = smov 0  }
   0x8   :  { %s2323_s20 = smov 0   ;;  %s2325_s21 = smov 0  }
   0x9 LB: > { %2896 = sst [smem:[#allocation14_spill]] %s2218_s18  ;;  %s2340_s22 = sadd.s32 4294967295, %s2230_s21   ;;  %s2230_s21 = sphi %s2325_s21, %s2914_s21   ;;  %s2226_s20 = sphi %s2323_s20, %s2916_s20   ;;  %s2222_s19 = sphi %s2321_s19, %s2918_s19   ;;  %s2218_s18 = sphi %s2319_s18, %s2917_s18  }
   0xa   : > { %2897 = sst [smem:[#allocation15_spill]] %s2226_s20  ;;  %s1852_s23 = sadd.s32 4294967294, %s2230_s21  }
   0xb   : > { %2898 = sst [smem:[#allocation16_spill]] %s2230_s21  ;;  %s2344_s24 = sadd.s32 1, %s2230_s21  }
   0xc   : > { %2899 = sst [smem:[#allocation17_spill]] %s2344_s24  ;;  %s357_s25 = sadd.s32 1, %s2226_s20 }
   0xd   : > { %s354_s26 = ssub.s32 %s2230_s21, %s2344_s24  ;;  %p367_p0 = scmp.ne.s32.totalorder %s2226_s20, %s2222_s19 }
   0xe   : > { %p355_p1 = scmp.eq.s32.totalorder %s354_s26, 0  ;;  %p368_p2 = scmp.eq.s32.totalorder %s2340_s22, 1 }
   0xf   : > { %p373_p3 = scmp.ne.s32.totalorder %s2222_s19, %s2218_s18  ;;  %p374_p4 = scmp.eq.s32.totalorder %s1852_s23, 1 }
  0x10   : > { %s2355_s27 = scalar_select %p355_p1, %s2226_s20, %s357_s25  }
  0x11   : > { %p2357_p5 = por %p368_p2, %p367_p0  ;;  %p2361_p6 = por %p374_p4, %p373_p3 }
  0x12   : > { %2900 = sst [smem:[#allocation18_spill]] %s2355_s27  ;;  %p1853_p7 = scmp.ge.s32.totalorder %s2230_s21, 1 }
  0x13   : > { %s2901_s28 = scalar_select %p2357_p5, 1, 0 }
  0x14   : > { %s2903_s29 = scalar_select %p2361_p6, 1, 0 }
  0x15   : > { %2902 = sst [smem:[#allocation19_spill]] %s2901_s28  ;;  %p381_p8 = scmp.lt.s32.totalorder %s2230_s21, 3 }
  0x16   : > { %2904 = sst [smem:[#allocation20_spill]] %s2903_s29  ;;  %p2023_p9 = scmp.eq.s32.totalorder %s2340_s22, 0 }
  0x17   : > { %p2368_p10 = pnand %p1853_p7, %p381_p8  ;;  %s2906_s4 = sld [smem:[#allocation22_spill]] }
  0x18   : > { %s2232_s25 = smov [#allocation7]   ;;  %s2908_s1 = sld [smem:[#allocation21_spill]] }
  0x19   : > { %p2009_p11 = pneg %p2368_p10  ;;  %s414_s26 = sshll.u32 %s2232_s25, 4  ;;  %s415_s26 = int_to_ptr.vmem [resolvable:$true] %s414_s26 }
  0x1a   : > { %s2233_s16 = smov 128   ;;  %s2234_s17 = smov 8  }
  0x1b   : > { %p2379_p12 = pnand %p2023_p9, %p2009_p11  ;;  %s2236_s18 = smov 256  }
  0x1c   : > { %s2237_s21 = smov 16   ;;  %s438_s20 = sshll.u32 %s2878_s9, 4  ;;  %s439_s20 = int_to_ptr.hbm [resolvable:$true] %s438_s20 }
  0x1d   : > { %s412_s23 = sshll.u32 %s2906_s4, 4  ;;  %s2235_s4 = smov [#allocation4]   ;;  %s413_s23 = int_to_ptr.hbm [resolvable:$true] %s412_s23 }
  0x1e   : > { %s392_s29 = sshll.u32 %s2908_s1, 4  ;;  %s394_s25 = sshll.u32 %s2235_s4, 4  ;;  %s393_s29 = int_to_ptr.hbm [resolvable:$true] %s392_s29  ;;  %s395_s25 = int_to_ptr.vmem [resolvable:$true] %s394_s25 }
  0x1f   : > { %2015 = dma.hbm_to_vmem [thread:$0]  (!%p2379_p12), %s413_s23, 4608, %s415_s26, [#allocation8], %s2233_s16, %s2233_s16, %s2234_s17  }
  0x20   : > { %2012 = dma.hbm_to_vmem [thread:$0]  (!%p2379_p12), %s393_s29, 5120, %s395_s25, [#allocation5], %s2236_s18, %s2236_s18, %s2237_s21  }
  0x21   : > { %s2238_s24 = smov [#allocation9]   ;;  %479 = sbr.rel (%p2368_p10) target bundleno = 1395 (0x573), region = 80 }
  0x22   : > { %s440_s1 = sshll.u32 %s2238_s24, 4  ;;  %s441_s1 = int_to_ptr.vmem [resolvable:$true] %s440_s1 }
  0x23   : > { %2018 = dma.hbm_to_vmem [thread:$0]  (!%p2379_p12), %s439_s20, 4096, %s441_s1, [#allocation8], %s2233_s16, %s2233_s16, %s2234_s17  }
  0x26   : > { %2205 = dma.done.wait (%p2023_p9), [#allocation5], 5120  }
  0x27   : > { %2207 = vsyncadd (%p2023_p9), [#allocation5], 4294962176 }
  0x28   : > { %2209 = dma.done.wait (%p2023_p9), [#allocation8], 8704  }
  0x29   : > { %2211 = vsyncadd (%p2023_p9), [#allocation8], 4294958592  ;;  %p537_p13 = scmp.lt.s32.totalorder %s2340_s22, 1  ;;  %vm575_vm0 = vcmask 1043456   ;;  %v563_v0 = vld [vmem:[#allocation4 + $0x70] sm:$0xf]  ;;  %s1762_s16 = scalar_lea.hbm %s2884_s15, %s2340_s22 }
  0x2a   : > { %v551_v1 = vld [vmem:[#allocation4 + $0x30] sm:$0xf]  ;;  %v561_v2 = vld [vmem:[#allocation4 + $0x60] sm:$0xff]  ;;  %1864 = vmatpush.msk.msra.mxu0 %vm575_vm0, %v563_v0  ;;  %1988 = vmatpush.msk.msra.mxu1 %vm575_vm0, %v563_v0  ;;  %v552_v7 = vld [vmem:[#allocation4 + $0x38] sm:$0xf]  ;;  %vm565_vm1 = vcmask 228352  }
  0x2b   : > { %s538_s4 = scalar_select %p537_p13, %s2340_s22, 1  ;;  %v549_v3 = vld [vmem:[#allocation4 + $0x20] sm:$0xff]  ;;  %1872 = vmatpush.msk.msra.mxu2 %vm575_vm0, %v551_v1  ;;  %v559_v4 = vld [vmem:[#allocation4 + $0x50] sm:$0xff]  ;;  %1876 = vmatpush.msk.msra.mxu3 %vm575_vm0, %v552_v7  ;;  %v550_v13 = vld [vmem:[#allocation4 + $0x28] sm:$0xff]  ;;  %vm976_vm2 = vcmask 195584   ;;  %vm1106_vm3 = vcmask 130048  }
  0x2c   : > { %595 = vmatpush.msra.mxu0 %v561_v2  ;;  %1989 = vmatpush.msra.mxu1 %v561_v2  ;;  %v547_v5 = vld [vmem:[#allocation4 + $0x10] sm:$0xff]  ;;  %v557_v6 = vld [vmem:[#allocation4 + $0x40] sm:$0xff]  ;;  %v564_v14 = vld [vmem:[#allocation4 + $0x78] sm:$0xf]  ;;  %vm1226_vm4 = vcmask 588800   ;;  %vm1228_vm5 = vcmask 584704  }
  0x2d   : > { %s1987_s1 = sshll.u32 %s538_s4, 5  ;;  %662 = vmatpush.msra.mxu2 %v549_v3  ;;  %v545_v8 = vld [vmem:[#allocation4] sm:$0xff]  ;;  %v711_v12 = vld [vmem:[#allocation4 + $0xb0] sm:$0xf]  ;;  %v548_v16 = vld [vmem:[#allocation4 + $0x18] sm:$0xff]  ;;  %688 = vmatpush.msra.mxu3 %v550_v13  ;;  %vm1409_vm6 = vcmask 64512  }
  0x2e   : > { %s2413_s21 = scalar_lea.vmem %s2869_s0, %s1987_s1  ;;  %596 = vmatpush.msra.mxu0 %v559_v4  ;;  %1990 = vmatpush.msra.mxu1 %v559_v4  ;;  %v709_v15 = vld [vmem:[#allocation4 + $0xa0] sm:$0xff]  ;;  %v796_v17 = vld [vmem:[#allocation4 + $0xf0] sm:$0xf]  ;;  %v562_v18 = vld [vmem:[#allocation4 + $0x68] sm:$0xff]  ;;  %vm1533_vm7 = vcmask 519168   ;;  %vm1554_vm8 = vcmask 523264  }
  0x2f   : > { %v2416_v9 = vld [vmem:[%s2413_s21 + $0x1] sm:$0xff]  ;;  %663 = vmatpush.msra.mxu2 %v547_v5  ;;  %v2419_v10 = vld [vmem:[%s2413_s21 + $0x9] sm:$0xff]  ;;  %v794_v19 = vld [vmem:[#allocation4 + $0xe0] sm:$0xff]  ;;  %689 = vmatpush.msra.mxu3 %v548_v16  ;;  %vm1688_vm9 = vcmask 982016   ;;  %vm1725_vm10 = vcmask 687104   ;;  %s535_s29 = sand.u32 1, %s2222_s19  }
  0x30   : > { %v542_v11 = vld [vmem:[%s2413_s21] sm:$0xff]  ;;  %597 = vmatpush.msra.mxu0 %v557_v6  ;;  %1991 = vmatpush.msra.mxu1 %v557_v6  ;;  %v560_v22 = vld [vmem:[#allocation4 + $0x58] sm:$0xff]  ;;  %v705_v23 = vld [vmem:[#allocation4 + $0x80] sm:$0xff]  ;;  %s2910_s20 = sld [smem:[#allocation23_spill]]  ;;  %s536_s24 = scalar_lea.vmem [#allocation10], %s535_s29 }
  0x31   : > { %664 = vmatpush.msra.mxu2 %v545_v8  ;;  %1865 = vmatmul.msk.f32.vlgmr.msra.gmra.mxu0 %vm565_vm1, %v2416_v9  ;;  %v707_v20 = vld [vmem:[#allocation4 + $0x90] sm:$0xff]  ;;  %v546_v21 = vld [vmem:[#allocation4 + $0x8] sm:$0xff]  ;;  %v555_v25 = vld [vmem:[%s2413_s21 + $0x11] sm:$0xff]  ;;  %s1764_s4 = sshll.u32 %s536_s24, 4  ;;  %s1766_s1 = sshll.u32 %s1762_s16, 4  ;;  %s1765_s4 = int_to_ptr.vmem [resolvable:$true] %s1764_s4  ;;  %s1767_s1 = int_to_ptr.hbm [resolvable:$true] %s1766_s1 }
  0x32   : > { %1866 = vmatmul.msk.f32.vlgmr.msra.gmra.mxu1 %vm565_vm1, %v2419_v10  ;;  %1873 = vmatmul.msk.f32.vlgmr.msra.gmra.mxu2 %vm565_vm1, %v542_v11  ;;  %v792_v24 = vld [vmem:[#allocation4 + $0xd0] sm:$0xff]  ;;  %v558_v28 = vld [vmem:[#allocation4 + $0x48] sm:$0xff]  ;;  %v790_v29 = vld [vmem:[#allocation4 + $0xc0] sm:$0xff]  ;;  %s1754_s14 = scalar_lea.sflag [#allocation6], %s535_s29  ;;  %s2174_s18 = sshra.s32 %s1767_s1, 4  ;;  %s2175_s18 = int_to_ptr.hbm [resolvable:$true] %s2174_s18 }
  0x33   : > { %1880 = vmatpush.msk.msrb.mxu0 %vm575_vm0, %v711_v12  ;;  %1868 = vmatpush.msk.msrb.mxu1 %vm575_vm0, %v564_v14  ;;  %v543_v26 = vld [vmem:[%s2413_s21 + $0x8] sm:$0xff]  ;;  %v881_v30 = vld [vmem:[#allocation4 + $0x130] sm:$0xf]  ;;  %v879_v33 = vld [vmem:[#allocation4 + $0x120] sm:$0xff]  ;;  %s2180_s28 = scalar_lea.hbm %s2884_s15, 2  ;;  %p2181_p3 = scmp.lt.s32.totalorder %s2175_s18, %s2884_s15 }
  0x34   : > { %1888 = vmatpush.msk.msrb.mxu2 %vm575_vm0, %v796_v17  ;;  %690 = vmatpush.msra.mxu3 %v546_v21  ;;  %v2434_v27 = vld [vmem:[%s2413_s21 + $0x2] sm:$0xff]  ;;  %v797_v31 = vld [vmem:[#allocation4 + $0xf8] sm:$0xf]  ;;  %v544_v39 = vld [vmem:[%s2413_s21 + $0x10] sm:$0xff] }
  0x35   : > { %741 = vmatpush.msrb.mxu0 %v709_v15  ;;  %621 = vmatpush.msrb.mxu1 %v562_v18  ;;  %v712_v32 = vld [vmem:[#allocation4 + $0xb8] sm:$0xf]  ;;  %v795_v34 = vld [vmem:[#allocation4 + $0xe8] sm:$0xff]  ;;  %v877_v36 = vld [vmem:[#allocation4 + $0x110] sm:$0xff] }
  0x36   : > { %826 = vmatpush.msrb.mxu2 %v794_v19  ;;  %1877 = vmatmul.msk.f32.vlgmr.msra.gmra.mxu3 %vm565_vm1, %v542_v11  ;;  %v710_v35 = vld [vmem:[#allocation4 + $0xa8] sm:$0xff]  ;;  %v793_v37 = vld [vmem:[#allocation4 + $0xd8] sm:$0xff]  ;;  %v875_v42 = vld [vmem:[#allocation4 + $0x100] sm:$0xff] }
  0x37   : > { %742 = vmatpush.msrb.mxu0 %v707_v20  ;;  %622 = vmatpush.msrb.mxu1 %v560_v22  ;;  %v708_v38 = vld [vmem:[#allocation4 + $0x98] sm:$0xff]  ;;  %v791_v41 = vld [vmem:[#allocation4 + $0xc8] sm:$0xff]  ;;  %v871_v51 = vld [vmem:[%s2413_s21 + $0x4] sm:$0xff] }
  0x38   : > { %827 = vmatpush.msrb.mxu2 %v792_v24  ;;  %1892 = vmatpush.msk.msrb.mxu3 %vm575_vm0, %v797_v31  ;;  %v702_v40 = vld [vmem:[%s2413_s21 + $0xa] sm:$0xff]  ;;  %v706_v43 = vld [vmem:[#allocation4 + $0x88] sm:$0xff]  ;;  %v703_v45 = vld [vmem:[%s2413_s21 + $0x12] sm:$0xff] }
  0x39   : > { %743 = vmatpush.msrb.mxu0 %v705_v23  ;;  %623 = vmatpush.msrb.mxu1 %v558_v28  ;;  %v786_v44 = vld [vmem:[%s2413_s21 + $0x3] sm:$0xff]  ;;  %v882_v46 = vld [vmem:[#allocation4 + $0x138] sm:$0xf]  ;;  %v788_v52 = vld [vmem:[%s2413_s21 + $0x13] sm:$0xff] }
  0x3a   : > { %1867 = vmatmul.msk.f32.gmra.mxu1 %vm565_vm1, %v555_v25  ;;  %1874 = vmatmul.msk.f32.gmra.mxu2 %vm565_vm1, %v543_v26  ;;  %v880_v47 = vld [vmem:[#allocation4 + $0x128] sm:$0xff]  ;;  %v878_v48 = vld [vmem:[#allocation4 + $0x118] sm:$0xff]  ;;  %v873_v54 = vld [vmem:[%s2413_s21 + $0x14] sm:$0xff] }
  0x3b   : > { %1881 = vmatmul.msk.f32.vlgmr.msrb.gmra.mxu0 %vm565_vm1, %v2434_v27  ;;  %828 = vmatpush.msrb.mxu2 %v790_v29  ;;  %v876_v49 = vld [vmem:[#allocation4 + $0x108] sm:$0xff]  ;;  %v787_v50 = vld [vmem:[%s2413_s21 + $0xb] sm:$0xff] }
  0x3c   : > { %1896 = vmatpush.msk.msra.mxu0 %vm575_vm0, %v881_v30  ;;  %1884 = vmatpush.msk.msra.mxu1 %vm575_vm0, %v712_v32  ;;  %v872_v53 = vld [vmem:[%s2413_s21 + $0xc] sm:$0xff]  ;;  %v956_v19 = vld [vmem:[%s2871_s2] sm:$0x3]  ;;  %s2176_s21 = scalar_lea.hbm %s2175_s18, 1 }
  0x3d   : > { %852 = vmatpush.msrb.mxu3 %v795_v34  ;;  %p2177_p0 = scmp.ne.s32.totalorder %s2175_s18, %s2176_s21  ;;  %p2182_p4 = scmp.lt.s32.totalorder %s2180_s28, %s2176_s21 }
  0x3e   : > { %911 = vmatpush.msra.mxu0 %v879_v33  ;;  %767 = vmatpush.msra.mxu1 %v710_v35 }
  0x3f   : > { %1878 = vmatmul.msk.f32.gmra.mxu3 %vm565_vm1, %v543_v26  ;;  %v958_v26 = vperm.slane %v956_v19, 0  ;;  %p2178_p1 = pnand %p2177_p0, %p2357_p5  ;;  %p2183_p7 = por %p2182_p4, %p2181_p3 }
  0x40   : > { %912 = vmatpush.msra.mxu0 %v877_v36  ;;  %853 = vmatpush.msrb.mxu3 %v793_v37  ;;  %v974_v36 = vld [vmem:[%s2872_s3] sm:$0xff] }
  0x41   : > { %768 = vmatpush.msra.mxu1 %v708_v38  ;;  %p2179_p2 = pneg %p2178_p1 }
  0x42   : > { %1869 = vmatmul.msk.f32.vlgmr.msrb.gmra.mxu1 %vm565_vm1, %v2416_v9  ;;  %1875 = vmatmul.msk.f32.gmra.mxu2 %vm565_vm1, %v544_v39 }
  0x43   : > { %1882 = vmatmul.msk.f32.gmra.mxu0 %vm565_vm1, %v702_v40  ;;  %854 = vmatpush.msrb.mxu3 %v791_v41  ;;  %p2184_p8 = pnand %p2183_p7, %p2179_p2 }
  0x44   : > { %913 = vmatpush.msra.mxu0 %v875_v42  ;;  %769 = vmatpush.msra.mxu1 %v706_v43 }
  0x46   : > { %1900 = vmatpush.msk.msrb.mxu1 %vm575_vm0, %v882_v46 }
  0x47   : > { %1879 = vmatmul.msk.f32.gmra.mxu3 %vm565_vm1, %v544_v39  ;;  %v975_v39 = vld [vmem:[%s2872_s3 + $0x8] sm:$0xf] }
  0x48   : > { %937 = vmatpush.msrb.mxu1 %v880_v47 }
  0x4a   : > { %1870 = vmatmul.msk.f32.gmra.mxu1 %vm565_vm1, %v2419_v10  ;;  %1889 = vmatmul.msk.f32.vlgmr.msrb.gmra.mxu2 %vm565_vm1, %v786_v44 }
  0x4b   : > { %1883 = vmatmul.msk.f32.gmra.mxu0 %vm565_vm1, %v703_v45  ;;  %938 = vmatpush.msrb.mxu1 %v878_v48  ;;  %v1103_v48 = vld [vmem:[#allocation7 + $0x78] sm:$0xff] }
  0x4c   : > { %1113 = vmatpush.msrb.mxu0 %v1103_v48  ;;  %v1926_v48 = vld [vmem:[%s2874_s5 + $0x88] sm:$0xff] }
  0x4d   : > { %939 = vmatpush.msrb.mxu1 %v876_v49  ;;  %v1102_v49 = vld [vmem:[#allocation7 + $0x70] sm:$0xff] }
  0x4e   : > { %1114 = vmatpush.msrb.mxu0 %v1102_v49  ;;  %v1239_v49 = vld [vmem:[%s2874_s5 + $0x40] sm:$0xff] }
  0x4f   : > { %1893 = vmatmul.msk.f32.vlgmr.msrb.gmra.mxu3 %vm565_vm1, %v786_v44 }
  0x52   : > { %1871 = vmatmul.msk.f32.gmra.mxu1 %vm565_vm1, %v555_v25  ;;  %1890 = vmatmul.msk.f32.gmra.mxu2 %vm565_vm1, %v787_v50 }
  0x53   : > { %1897 = vmatmul.msk.f32.vlgmr.msra.gmra.mxu0 %vm565_vm1, %v871_v51 }
  0x57   : > { %1894 = vmatmul.msk.f32.gmra.mxu3 %vm565_vm1, %v787_v50 }
  0x5a   : > { %1885 = vmatmul.msk.f32.vlgmr.msra.gmra.mxu1 %vm565_vm1, %v2434_v27  ;;  %1891 = vmatmul.msk.f32.gmra.mxu2 %vm565_vm1, %v788_v52 }
  0x5b   : > { %1898 = vmatmul.msk.f32.gmra.mxu0 %vm565_vm1, %v872_v53 }
  0x5f   : > { %1895 = vmatmul.msk.f32.gmra.mxu3 %vm565_vm1, %v788_v52 }
  0x62   : > { %1886 = vmatmul.msk.f32.gmra.mxu1 %vm565_vm1, %v702_v40 }
  0x63   : > { %1899 = vmatmul.msk.f32.gmra.mxu0 %vm565_vm1, %v873_v54 }
  0x6a   : > { %1887 = vmatmul.msk.f32.gmra.mxu1 %vm565_vm1, %v703_v45 }
  0x72   : > { %1901 = vmatmul.msk.f32.vlgmr.msrb.gmra.mxu1 %vm565_vm1, %v871_v51 }
  0x7a   : > { %1902 = vmatmul.msk.f32.gmra.mxu1 %vm565_vm1, %v872_v53 }
  0x82   : > { %1903 = vmatmul.msk.f32.gmra.mxu1 %vm565_vm1, %v873_v54 }
  0xae   : > { %v599_v55 = vpop.f32.mrf.mxu0 }
  0xaf   : > { %v602_v56 = vpop.f32.mrf.mxu1 }
  0xb5   : > { %v666_v57 = vpop.f32.mrf.mxu2 }
  0xb6   : > { %v667_v9 = vadd.f32 %v666_v57, %v599_v55 }
  0xb7   : > { %v605_v58 = vpop.f32.mrf.mxu1 }
  0xb8   : > { %v745_v59 = vpop.f32.mrf.mxu0 }
  0xb9   : > { %v692_v2 = vpop.f32.mrf.mxu3  ;;  %v780_v14 = vadd.f32 %v745_v59, %v667_v9  ;;  %v1171_v9 = vld [vmem:[#allocation7 + $0xe8] sm:$0xff] }
  0xbd   : > { %v669_v60 = vpop.f32.mrf.mxu2 }
  0xbe   : > { %v670_v6 = vadd.f32 %v669_v60, %v602_v56  ;;  %v959_v56 = vperm.slane %v956_v19, 1  ;;  %v1166_v19 = vld [vmem:[#allocation7 + $0xc0] sm:$0xff] }
  0xbf   : > { %v625_v61 = vpop.f32.mrf.mxu1 }
  0xc0   : > { %v748_v62 = vpop.f32.mrf.mxu0  ;;  %v693_v42 = vadd.f32 %v692_v2, %v625_v61  ;;  %v1174_v2 = vld [vmem:[#allocation7 + $0x100] sm:$0xff] }
  0xc1   : > { %v782_v13 = vadd.f32 %v748_v62, %v670_v6  ;;  %v1100_v6 = vld [vmem:[#allocation7 + $0x60] sm:$0xff] }
  0xc2   : > { %v695_v7 = vpop.f32.mrf.mxu3 }
  0xc5   : > { %v672_v63 = vpop.f32.mrf.mxu2 }
  0xc6   : > { %v673_v11 = vadd.f32 %v672_v63, %v605_v58 }
  0xc7   : > { %v628_v0 = vpop.f32.mrf.mxu1 }
  0xc8   : > { %v751_v1 = vpop.f32.mrf.mxu0  ;;  %v696_v40 = vadd.f32 %v695_v7, %v628_v0  ;;  %v1175_v0 = vld [vmem:[#allocation7 + $0x108] sm:$0xff]  ;;  %v1172_v7 = vld [vmem:[#allocation7 + $0xf0] sm:$0xff] }
  0xc9   : > { %v784_v16 = vadd.f32 %v751_v1, %v673_v11  ;;  %v1908_v1 = vld [vmem:[%s2872_s3 + $0x10] sm:$0xff] }
  0xca   : > { %v698_v21 = vpop.f32.mrf.mxu3  ;;  %v1170_v11 = vld [vmem:[#allocation7 + $0xe0] sm:$0xff] }
  0xcd   : > { %v830_v3 = vpop.f32.mrf.mxu2 }
  0xce   : > { %v865_v17 = vadd.f32 %v830_v3, %v780_v14  ;;  %v1909_v3 = vld [vmem:[%s2872_s3 + $0x18] sm:$0xf] }
  0xcf   : > { %v631_v4 = vpop.f32.mrf.mxu1  ;;  %v1096_v14 = vld [vmem:[#allocation7 + $0x40] sm:$0xff] }
  0xd0   : > { %v915_v5 = vpop.f32.mrf.mxu0  ;;  %v699_v43 = vadd.f32 %v698_v21, %v631_v4  ;;  %v1101_v4 = vld [vmem:[#allocation7 + $0x68] sm:$0xff]  ;;  %v1165_v21 = vld [vmem:[#allocation7 + $0xb8] sm:$0xff] }
  0xd1   : > { %v950_v25 = vadd.f32 %v915_v5, %v865_v17  ;;  %v1173_v5 = vld [vmem:[#allocation7 + $0xf8] sm:$0xff]  ;;  %1115 = vmatpush.msrb.mxu0 %v1101_v4  ;;  %v1167_v17 = vld [vmem:[#allocation7 + $0xc8] sm:$0xff] }
  0xd2   : > { %v856_v33 = vpop.f32.mrf.mxu3  ;;  %v1919_v4 = vld [vmem:[%s2874_s5 + $0x50] sm:$0xff] }
  0xd3   : > { %v962_v30 = vadd.f32 %v958_v26, %v950_v25  ;;  %1116 = vmatpush.msrb.mxu0 %v1100_v6  ;;  %v1163_v25 = vld [vmem:[#allocation7 + $0xa8] sm:$0xff] }
  0xd4   : > { %v1934_v6 = vld [vmem:[%s2874_s5 + $0xb8] sm:$0xff] }
  0xd5   : > { %v833_v8 = vpop.f32.mrf.mxu2  ;;  %v968_v35 = vmax.f32 %v962_v30, 0.0  ;;  %v1161_v30 = vld [vmem:[#allocation7 + $0x98] sm:$0xff] }
  0xd6   : > { %v867_v15 = vadd.f32 %v833_v8, %v782_v13  ;;  %v1099_v8 = vld [vmem:[#allocation7 + $0x58] sm:$0xff] }
  0xd7   : > { %v771_v10 = vpop.f32.mrf.mxu1  ;;  %1117 = vmatpush.msrb.mxu0 %v1099_v8  ;;  %v1169_v13 = vld [vmem:[#allocation7 + $0xd8] sm:$0xff] }
  0xd8   : > { %v918_v12 = vpop.f32.mrf.mxu0  ;;  %v781_v45 = vadd.f32 %v771_v10, %v693_v42  ;;  %v1098_v10 = vld [vmem:[#allocation7 + $0x50] sm:$0xff] }
  0xd9   : > { %v952_v22 = vadd.f32 %v918_v12, %v867_v15  ;;  %1118 = vmatpush.msrb.mxu0 %v1098_v10  ;;  %v1097_v12 = vld [vmem:[#allocation7 + $0x48] sm:$0xff]  ;;  %v1168_v15 = vld [vmem:[#allocation7 + $0xd0] sm:$0xff]  ;;  %v1933_v10 = vld [vmem:[%s2874_s5 + $0xb0] sm:$0xff] }
  0xda   : > { %v859_v38 = vpop.f32.mrf.mxu3  ;;  %v866_v51 = vadd.f32 %v856_v33, %v781_v45  ;;  %v1104_v33 = vld [vmem:[#allocation7 + $0x80] sm:$0xff]  ;;  %v1918_v8 = vld [vmem:[%s2874_s5 + $0x48] sm:$0xff] }
  0xdb   : > { %v964_v28 = vadd.f32 %v958_v26, %v952_v22  ;;  %1119 = vmatpush.msrb.mxu0 %v1097_v12  ;;  %v1092_v22 = vld [vmem:[#allocation7 + $0x20] sm:$0xff]  ;;  %v1953_v12 = vld [vmem:[%s2874_s5 + $0x140] sm:$0xff] }
  0xdd   : > { %v836_v18 = vpop.f32.mrf.mxu2  ;;  %v970_v32 = vmax.f32 %v964_v28, 0.0  ;;  %1120 = vmatpush.msrb.mxu0 %v1096_v14  ;;  %v1089_v28 = vld [vmem:[#allocation7 + $0x8] sm:$0xff]  ;;  %v1946_v14 = vld [vmem:[%s2874_s5 + $0x110] sm:$0xff] }
  0xde   : > { %v869_v20 = vadd.f32 %v836_v18, %v784_v16  ;;  %v1095_v16 = vld [vmem:[#allocation7 + $0x38] sm:$0xff]  ;;  %v1094_v18 = vld [vmem:[#allocation7 + $0x30] sm:$0xff] }
  0xdf   : > { %v774_v23 = vpop.f32.mrf.mxu1  ;;  %1121 = vmatpush.msrb.mxu0 %v1095_v16  ;;  %v1931_v16 = vld [vmem:[%s2874_s5 + $0xa0] sm:$0xff] }
  0xe0   : > { %v921_v24 = vpop.f32.mrf.mxu0  ;;  %v783_v44 = vadd.f32 %v774_v23, %v696_v40  ;;  %v1164_v23 = vld [vmem:[#allocation7 + $0xb0] sm:$0xff] }
  0xe1   : > { %v954_v27 = vadd.f32 %v921_v24, %v869_v20  ;;  %1122 = vmatpush.msrb.mxu0 %v1094_v18  ;;  %v1093_v20 = vld [vmem:[#allocation7 + $0x28] sm:$0xff]  ;;  %v1091_v24 = vld [vmem:[#allocation7 + $0x18] sm:$0xff] }
  0xe2   : > { %v862_v47 = vpop.f32.mrf.mxu3  ;;  %v868_v50 = vadd.f32 %v859_v38, %v783_v44  ;;  %v1951_v18 = vld [vmem:[%s2874_s5 + $0x130] sm:$0xff] }
  0xe3   : > { %v966_v29 = vadd.f32 %v958_v26, %v954_v27  ;;  %1123 = vmatpush.msrb.mxu0 %v1093_v20  ;;  %v1090_v26 = vld [vmem:[#allocation7 + $0x10] sm:$0xff]  ;;  %v1162_v27 = vld [vmem:[#allocation7 + $0xa0] sm:$0xff] }
  0xe4   : > { %v1944_v20 = vld [vmem:[%s2874_s5 + $0x100] sm:$0xff] }
  0xe5   : > { %v972_v31 = vmax.f32 %v966_v29, 0.0  ;;  %1124 = vmatpush.msrb.mxu0 %v1092_v22  ;;  %v1105_v29 = vld [vmem:[#allocation7 + $0x88] sm:$0xff]  ;;  %v1929_v22 = vld [vmem:[%s2874_s5 + $0x90] sm:$0xff] }
  0xe6   : > { %1150 = vmatpush.msra.mxu1 %v1105_v29 }
  0xe7   : > { %996 = vmatpush.msra.mxu2 %v972_v31  ;;  %v777_v34 = vpop.f32.mrf.mxu1  ;;  %1125 = vmatpush.msrb.mxu0 %v1091_v24  ;;  %v1949_v24 = vld [vmem:[%s2874_s5 + $0x120] sm:$0xff] }
  0xe8   : > { %v785_v46 = vadd.f32 %v777_v34, %v699_v43  ;;  %v1160_v34 = vld [vmem:[#allocation7 + $0x90] sm:$0xff]  ;;  %1151 = vmatpush.msra.mxu1 %v1104_v33 }
  0xe9   : > { %997 = vmatpush.msra.mxu2 %v970_v32  ;;  %1126 = vmatpush.msrb.mxu0 %v1090_v26  ;;  %v1941_v26 = vld [vmem:[%s2874_s5 + $0xe8] sm:$0xff] }
  0xea   : > { %v870_v52 = vadd.f32 %v862_v47, %v785_v46  ;;  %1261 = vmatpush.msrb.mxu1 %v1926_v48 }
  0xeb   : > { %998 = vmatpush.msra.mxu2 %v968_v35  ;;  %1127 = vmatpush.msrb.mxu0 %v1089_v28  ;;  %v1939_v28 = vld [vmem:[%s2874_s5 + $0xd8] sm:$0xff] }
  0xec   : > { %1904 = vmatmul.msk.f32.vlgmr.msra.gmra.mxu2 %vm976_vm2, %v974_v36 }
  0xef   : > { %v941_v37 = vpop.f32.mrf.mxu1 }
  0xf0   : > { %v951_v55 = vadd.f32 %v941_v37, %v866_v51  ;;  %v1238_v51 = vld [vmem:[%s2874_s5 + $0x38] sm:$0xff] }
  0xf2   : > { %v963_v60 = vadd.f32 %v959_v56, %v951_v55  ;;  %v1236_v55 = vld [vmem:[%s2874_s5 + $0x28] sm:$0xff] }
  0xf4   : > { %1905 = vmatmul.msk.f32.gmra.mxu2 %vm976_vm2, %v975_v39  ;;  %v969_v63 = vmax.f32 %v963_v60, 0.0  ;;  %v1921_v60 = vld [vmem:[%s2874_s5 + $0x60] sm:$0xff] }
  0xf7   : > { %v944_v41 = vpop.f32.mrf.mxu1 }
  0xf8   : > { %v953_v53 = vadd.f32 %v944_v41, %v868_v50  ;;  %v1925_v50 = vld [vmem:[%s2874_s5 + $0x80] sm:$0xff] }
  0xf9   : > { %1262 = vmatpush.msrb.mxu1 %v1925_v50 }
  0xfa   : > { %v965_v58 = vadd.f32 %v959_v56, %v953_v53  ;;  %v1237_v53 = vld [vmem:[%s2874_s5 + $0x30] sm:$0xff] }
  0xfc   : > { %v971_v62 = vmax.f32 %v965_v58, 0.0  ;;  %v1937_v58 = vld [vmem:[%s2874_s5 + $0xd0] sm:$0xff] }
  0xff   : > { %v947_v54 = vpop.f32.mrf.mxu1 }
 0x100   : > { %v955_v57 = vadd.f32 %v947_v54, %v870_v52  ;;  %v1924_v52 = vld [vmem:[%s2874_s5 + $0x78] sm:$0xff]  ;;  %v1923_v54 = vld [vmem:[%s2874_s5 + $0x70] sm:$0xff] }
 0x101   : > { %1263 = vmatpush.msrb.mxu1 %v1924_v52 }
 0x102   : > { %v967_v59 = vadd.f32 %v959_v56, %v955_v57  ;;  %v1922_v56 = vld [vmem:[%s2874_s5 + $0x68] sm:$0xff]  ;;  %v1235_v57 = vld [vmem:[%s2874_s5 + $0x20] sm:$0xff] }
 0x103   : > { %1264 = vmatpush.msrb.mxu1 %v1923_v54 }
 0x104   : > { %v973_v61 = vmax.f32 %v967_v59, 0.0  ;;  %v1957_v59 = vld [vmem:[%s2874_s5 + $0x160] sm:$0xff] }
 0x105   : > { %1265 = vmatpush.msrb.mxu1 %v1922_v56 }
 0x106   : > { %1019 = vmatpush.msrb.mxu2 %v973_v61  ;;  %1992 = vmatpush.msra.mxu3 %v973_v61 }
 0x107   : > { %1266 = vmatpush.msrb.mxu1 %v1921_v60  ;;  %v1960_v60 = vld [vmem:[%s2876_s7 + $0x4] sm:$0xf] }
 0x108   : > { %1020 = vmatpush.msrb.mxu2 %v971_v62  ;;  %1993 = vmatpush.msra.mxu3 %v971_v62 }
 0x10a   : > { %1021 = vmatpush.msrb.mxu2 %v969_v63  ;;  %1994 = vmatpush.msra.mxu3 %v969_v63 }
 0x10b   : > { %1906 = vmatmul.msk.f32.vlgmr.msrb.gmra.mxu2 %vm976_vm2, %v974_v36  ;;  %1907 = vmatmul.msk.f32.vlgmr.msra.gmra.mxu3 %vm976_vm2, %v975_v39 }
 0x10c   : > { %1051 = vmatpush.msra.mxu2 %v972_v31  ;;  %1074 = vmatpush.msrb.mxu3 %v973_v61  ;;  %v1177_v31 = vld [vmem:[#allocation7 + $0x118] sm:$0xff]  ;;  %v1234_v61 = vld [vmem:[%s2874_s5 + $0x18] sm:$0xff] }
 0x10e   : > { %1052 = vmatpush.msra.mxu2 %v970_v32  ;;  %1075 = vmatpush.msrb.mxu3 %v971_v62  ;;  %v1088_v32 = vld [vmem:[#allocation7] sm:$0xff]  ;;  %v1936_v62 = vld [vmem:[%s2874_s5 + $0xc8] sm:$0xff] }
 0x10f   : > { %1128 = vmatpush.msrb.mxu0 %v1088_v32 }
 0x110   : > { %1053 = vmatpush.msra.mxu2 %v968_v35  ;;  %1076 = vmatpush.msrb.mxu3 %v969_v63  ;;  %v1176_v35 = vld [vmem:[#allocation7 + $0x110] sm:$0xff]  ;;  %v1956_v63 = vld [vmem:[%s2874_s5 + $0x158] sm:$0xff] }
 0x111   : > { %1284 = vmatpush.msra.mxu0 %v1239_v49 }
 0x112   : > { %1178 = vmatpush.msrb.mxu2 %v1175_v0  ;;  %1215 = vmatpush.msra.mxu3 %v1177_v31  ;;  %v1920_v0 = vld [vmem:[%s2874_s5 + $0x58] sm:$0xff] }
 0x113   : > { %1910 = vmatmul.msk.f32.vlgmr.msra.gmra.mxu2 %vm976_vm2, %v1908_v1  ;;  %1912 = vmatmul.msk.f32.vlgmr.msrb.gmra.mxu3 %vm976_vm2, %v1908_v1  ;;  %v1233_v1 = vld [vmem:[%s2874_s5 + $0x10] sm:$0xff] }
 0x114   : > { %1179 = vmatpush.msrb.mxu2 %v1174_v2  ;;  %1216 = vmatpush.msra.mxu3 %v1176_v35  ;;  %v1935_v2 = vld [vmem:[%s2874_s5 + $0xc0] sm:$0xff] }
 0x115   : > { %1285 = vmatpush.msra.mxu0 %v1238_v51  ;;  %1267 = vmatpush.msrb.mxu1 %v1920_v0  ;;  %v1976_v0 = vld [vmem:[%s2877_s8 + $0xf0] sm:$0xff] }
 0x116   : > { %1180 = vmatpush.msrb.mxu2 %v1173_v5  ;;  %1318 = vmatpush.msrb.mxu3 %v1937_v58  ;;  %v1232_v5 = vld [vmem:[%s2874_s5 + $0x8] sm:$0xff] }
 0x117   : > { %1286 = vmatpush.msra.mxu0 %v1237_v53  ;;  %1268 = vmatpush.msrb.mxu1 %v1919_v4  ;;  %v1974_v4 = vld [vmem:[%s2877_s8 + $0xe0] sm:$0xff] }
 0x118   : > { %1181 = vmatpush.msrb.mxu2 %v1172_v7  ;;  %1319 = vmatpush.msrb.mxu3 %v1936_v62  ;;  %v1954_v7 = vld [vmem:[%s2874_s5 + $0x148] sm:$0xff]  ;;  %v1977_v62 = vld [vmem:[%s2877_s8 + $0xf8] sm:$0xff] }
 0x119   : > { %1287 = vmatpush.msra.mxu0 %v1236_v55  ;;  %1269 = vmatpush.msrb.mxu1 %v1918_v8  ;;  %v2069_v55 = vld [vmem:[%s2875_s6] ss:$0 sm:$0xff]  ;;  %v1972_v8 = vld [vmem:[%s2877_s8 + $0xd0] sm:$0xff] }
 0x11a   : > { %1182 = vmatpush.msrb.mxu2 %v1171_v9  ;;  %1320 = vmatpush.msrb.mxu3 %v1935_v2  ;;  %v1231_v9 = vld [vmem:[%s2874_s5] sm:$0xff]  ;;  %v1975_v2 = vld [vmem:[%s2877_s8 + $0xe8] sm:$0xff] }
 0x11b   : > { %1911 = vmatmul.msk.f32.gmra.mxu2 %vm976_vm2, %v1909_v3  ;;  %1913 = vmatmul.msk.f32.gmra.mxu3 %vm976_vm2, %v1909_v3  ;;  %v1955_v3 = vld [vmem:[%s2874_s5 + $0x150] sm:$0xff] }
 0x11c   : > { %1183 = vmatpush.msrb.mxu2 %v1170_v11  ;;  %1288 = vmatpush.msra.mxu0 %v1235_v57  ;;  %v1947_v11 = vld [vmem:[%s2874_s5 + $0x118] sm:$0xff] }
 0x11d   : > { %1321 = vmatpush.msrb.mxu3 %v1934_v6  ;;  %v1973_v6 = vld [vmem:[%s2877_s8 + $0xd8] sm:$0xff] }
 0x11e   : > { %1184 = vmatpush.msrb.mxu2 %v1169_v13  ;;  %1289 = vmatpush.msra.mxu0 %v1234_v61  ;;  %v1932_v13 = vld [vmem:[%s2874_s5 + $0xa8] sm:$0xff]  ;;  %v1408_v61 = vld [vmem:[%s2876_s7] sm:$0xf] }
 0x11f   : > { %1322 = vmatpush.msrb.mxu3 %v1933_v10  ;;  %v1971_v10 = vld [vmem:[%s2877_s8 + $0xc8] sm:$0xff] }
 0x120   : > { %1185 = vmatpush.msrb.mxu2 %v1168_v15  ;;  %1290 = vmatpush.msra.mxu0 %v1233_v1  ;;  %v1952_v15 = vld [vmem:[%s2874_s5 + $0x138] sm:$0xff]  ;;  %v1473_v1 = vld [vmem:[%s2877_s8 + $0x70] sm:$0xff] }
 0x121   : > { %1323 = vmatpush.msrb.mxu3 %v1932_v13  ;;  %v1467_v13 = vld [vmem:[%s2877_s8 + $0x40] sm:$0xff] }
 0x122   : > { %1186 = vmatpush.msrb.mxu2 %v1167_v17  ;;  %1291 = vmatpush.msra.mxu0 %v1232_v5  ;;  %v1945_v17 = vld [vmem:[%s2874_s5 + $0x108] sm:$0xff]  ;;  %v1471_v5 = vld [vmem:[%s2877_s8 + $0x60] sm:$0xff] }
 0x123   : > { %1324 = vmatpush.msrb.mxu3 %v1931_v16  ;;  %v1968_v16 = vld [vmem:[%s2877_s8 + $0xb0] sm:$0xff] }
 0x124   : > { %1187 = vmatpush.msrb.mxu2 %v1166_v19  ;;  %1292 = vmatpush.msra.mxu0 %v1231_v9  ;;  %v1930_v19 = vld [vmem:[%s2874_s5 + $0x98] sm:$0xff]  ;;  %v1469_v9 = vld [vmem:[%s2877_s8 + $0x50] sm:$0xff] }
 0x125   : > { %1325 = vmatpush.msrb.mxu3 %v1930_v19  ;;  %v1464_v19 = vld [vmem:[%s2877_s8 + $0x28] sm:$0xff] }
 0x126   : > { %1188 = vmatpush.msrb.mxu2 %v1165_v21  ;;  %v1950_v21 = vld [vmem:[%s2874_s5 + $0x128] sm:$0xff] }
 0x127   : > { %1326 = vmatpush.msrb.mxu3 %v1929_v22  ;;  %v1964_v22 = vld [vmem:[%s2877_s8 + $0x90] sm:$0xff] }
 0x128   : > { %1189 = vmatpush.msrb.mxu2 %v1164_v23  ;;  %v1943_v23 = vld [vmem:[%s2874_s5 + $0xf8] sm:$0xff] }
 0x12a   : > { %1190 = vmatpush.msrb.mxu2 %v1163_v25  ;;  %v1942_v25 = vld [vmem:[%s2874_s5 + $0xf0] sm:$0xff] }
 0x12c   : > { %1191 = vmatpush.msrb.mxu2 %v1162_v27  ;;  %v1940_v27 = vld [vmem:[%s2874_s5 + $0xe0] sm:$0xff] }
 0x12e   : > { %1192 = vmatpush.msrb.mxu2 %v1161_v30 }
 0x130   : > { %1193 = vmatpush.msrb.mxu2 %v1160_v34 }
 0x132   : > { %1388 = vmatpush.msra.mxu2 %v1957_v59 }
 0x134   : > { %1389 = vmatpush.msra.mxu2 %v1956_v63  ;;  %v1474_v63 = vld [vmem:[%s2877_s8 + $0x78] sm:$0xff] }
 0x136   : > { %1390 = vmatpush.msra.mxu2 %v1955_v3  ;;  %v1472_v3 = vld [vmem:[%s2877_s8 + $0x68] sm:$0xff] }
 0x138   : > { %1391 = vmatpush.msra.mxu2 %v1954_v7  ;;  %v1470_v7 = vld [vmem:[%s2877_s8 + $0x58] sm:$0xff] }
 0x13a   : > { %1392 = vmatpush.msra.mxu2 %v1953_v12  ;;  %v1970_v12 = vld [vmem:[%s2877_s8 + $0xc0] sm:$0xff] }
 0x13c   : > { %1393 = vmatpush.msra.mxu2 %v1952_v15  ;;  %v1466_v15 = vld [vmem:[%s2877_s8 + $0x38] sm:$0xff] }
 0x13e   : > { %1394 = vmatpush.msra.mxu2 %v1951_v18  ;;  %v1967_v18 = vld [vmem:[%s2877_s8 + $0xa8] sm:$0xff] }
 0x140   : > { %1395 = vmatpush.msra.mxu2 %v1950_v21  ;;  %v1965_v21 = vld [vmem:[%s2877_s8 + $0x98] sm:$0xff] }
 0x142   : > { %1396 = vmatpush.msra.mxu2 %v1949_v24  ;;  %v1462_v24 = vld [vmem:[%s2877_s8 + $0x18] sm:$0xff] }
 0x16f   : > { %v1000_v36 = vpop.f32.mrf.mxu2 }
 0x177   : > { %v1003_v37 = vpop.f32.mrf.mxu2 }
 0x18e   : > { %v1023_v38 = vpop.f32.mrf.mxu2  ;;  %v1026_v39 = vpop.f32.mrf.mxu3 }
 0x196   : > { %v1055_v40 = vpop.f32.mrf.mxu2  ;;  %v1078_v41 = vpop.f32.mrf.mxu3 }
 0x197   : > { %v1084_v42 = vmax.f32 %v1000_v36, %v1055_v40  ;;  %v1085_v43 = vmax.f32 %v1023_v38, %v1078_v41 }
 0x199   : > { %1129 = vmatmul.f32.vlgmr.msrb.gmra.mxu0 %v1084_v42  ;;  %1914 = vmatmul.msk.f32.vlgmr.msra.gmra.mxu1 %vm1106_vm3, %v1085_v43 }
 0x19a   : > { %1194 = vmatmul.f32.vlgmr.msrb.gmra.mxu2 %v1084_v42  ;;  %1916 = vmatmul.msk.f32.vlgmr.msra.gmra.mxu3 %vm1106_vm3, %v1085_v43 }
 0x19b   : > { %1353 = vmatpush.msra.mxu1 %v1947_v11  ;;  %v1468_v11 = vld [vmem:[%s2877_s8 + $0x48] sm:$0xff] }
 0x19d   : > { %1354 = vmatpush.msra.mxu1 %v1946_v14  ;;  %v1969_v14 = vld [vmem:[%s2877_s8 + $0xb8] sm:$0xff] }
 0x19e   : > { %v1058_v44 = vpop.f32.mrf.mxu2  ;;  %v1081_v45 = vpop.f32.mrf.mxu3 }
 0x19f   : > { %v1086_v46 = vmax.f32 %v1003_v37, %v1058_v44  ;;  %v1087_v47 = vmax.f32 %v1026_v39, %v1081_v45  ;;  %1355 = vmatpush.msra.mxu1 %v1945_v17  ;;  %v1465_v17 = vld [vmem:[%s2877_s8 + $0x30] sm:$0xff] }
 0x1a1   : > { %1132 = vmatmul.f32.gmra.mxu0 %v1086_v46  ;;  %1915 = vmatmul.msk.f32.gmra.mxu1 %vm1106_vm3, %v1087_v47 }
 0x1a2   : > { %1197 = vmatmul.f32.gmra.mxu2 %v1086_v46  ;;  %1917 = vmatmul.msk.f32.gmra.mxu3 %vm1106_vm3, %v1087_v47 }
 0x1a3   : > { %1356 = vmatpush.msra.mxu1 %v1944_v20  ;;  %v1966_v20 = vld [vmem:[%s2877_s8 + $0xa0] sm:$0xff] }
 0x1a5   : > { %1357 = vmatpush.msra.mxu1 %v1943_v23  ;;  %v1463_v23 = vld [vmem:[%s2877_s8 + $0x20] sm:$0xff] }
 0x1a7   : > { %1358 = vmatpush.msra.mxu1 %v1942_v25  ;;  %v1461_v25 = vld [vmem:[%s2877_s8 + $0x10] sm:$0xff] }
 0x1a9   : > { %1359 = vmatpush.msra.mxu1 %v1941_v26  ;;  %v1963_v26 = vld [vmem:[%s2877_s8 + $0x88] sm:$0xff] }
 0x1ab   : > { %1360 = vmatpush.msra.mxu1 %v1940_v27  ;;  %v1460_v27 = vld [vmem:[%s2877_s8 + $0x8] sm:$0xff] }
 0x1ad   : > { %1361 = vmatpush.msra.mxu1 %v1939_v28  ;;  %v1962_v28 = vld [vmem:[%s2877_s8 + $0x80] sm:$0xff] }
 0x216   : > { %v1130_v29 = vpop.f32.mrf.mxu0  ;;  %v1153_v30 = vpop.f32.mrf.mxu1 }
 0x217   : > { %v1154_v33 = vadd.f32 %v1153_v30, %v1130_v29  ;;  %v1459_v29 = vld [vmem:[%s2877_s8] sm:$0xff]  ;;  %v1543_v30 = vld [vmem:[#allocation9 + $0x38] sm:$0xff] }
 0x218   : > { %1589 = vmatpush.msrb.mxu2 %v1543_v30 }
 0x21d   : > { %v1195_v31 = vpop.f32.mrf.mxu2  ;;  %v1218_v32 = vpop.f32.mrf.mxu3 }
 0x21e   : > { %v1219_v34 = vadd.f32 %v1218_v32, %v1195_v31  ;;  %v1133_v36 = vpop.f32.mrf.mxu0  ;;  %v1156_v37 = vpop.f32.mrf.mxu1  ;;  %v1542_v31 = vld [vmem:[#allocation9 + $0x30] sm:$0xff]  ;;  %v1553_v32 = vld [vmem:[#allocation9 + $0x78] sm:$0xff] }
 0x21f   : > { %v1157_v40 = vadd.f32 %v1156_v37, %v1133_v36  ;;  %1590 = vmatpush.msrb.mxu2 %v1542_v31  ;;  %v1540_v36 = vld [vmem:[#allocation9 + $0x20] sm:$0xff] }
 0x220   : > { %v1224_v35 = vmax.f32 %v1154_v33, %v1219_v34  ;;  %v1552_v33 = vld [vmem:[#allocation9 + $0x70] sm:$0xff]  ;;  %v1541_v34 = vld [vmem:[#allocation9 + $0x28] sm:$0xff]  ;;  %v1550_v37 = vld [vmem:[#allocation9 + $0x60] sm:$0xff] }
 0x221   : > { %1591 = vmatpush.msrb.mxu2 %v1541_v34  ;;  %v1716_v31 = vld [vmem:[%s2882_s13 + $0x18] sm:$0xff] }
 0x222   : > { %1227 = vst.msk [vmem:[#allocation2] sm:$0xff] %vm1226_vm4, %v1224_v35  ;;  %v1551_v35 = vld [vmem:[#allocation9 + $0x68] sm:$0xff] }
 0x223   : > { %1592 = vmatpush.msrb.mxu2 %v1540_v36 }
 0x225   : > { %v1198_v38 = vpop.f32.mrf.mxu2  ;;  %v1221_v39 = vpop.f32.mrf.mxu3 }
 0x226   : > { %v1222_v41 = vadd.f32 %v1221_v39, %v1198_v38  ;;  %v1539_v38 = vld [vmem:[#allocation9 + $0x18] sm:$0xff]  ;;  %v1538_v39 = vld [vmem:[#allocation9 + $0x10] sm:$0xff] }
 0x227   : > { %1593 = vmatpush.msrb.mxu2 %v1539_v38 }
 0x228   : > { %v1225_v42 = vmax.f32 %v1157_v40, %v1222_v41 }
 0x229   : > { %v1230_v43 = vld [vmem:[#allocation2] sm:$0xff]  ;;  %1594 = vmatpush.msrb.mxu2 %v1538_v39 }
 0x22a   : > { %1229 = vst.msk [vmem:[#allocation2 + $0x8] sm:$0xf] %vm1228_vm5, %v1225_v42  ;;  %1928 = vmatmul.msk.f32.vlgmr.msra.gmra.mxu0 %vm1226_vm4, %v1230_v43  ;;  %v1549_v43 = vld [vmem:[#allocation9 + $0x58] sm:$0xff] }
 0x231   : > { %v1240_v44 = vld [vmem:[#allocation2 + $0x1] sm:$0xff] }
 0x232   : > { %v1297_v45 = vld [vmem:[#allocation2 + $0x2] sm:$0xff]  ;;  %1927 = vmatmul.msk.f32.vlgmr.msrb.gmra.mxu1 %vm1226_vm4, %v1240_v44 }
 0x233   : > { %v1367_v46 = vld [vmem:[#allocation2 + $0x4] sm:$0xff]  ;;  %1938 = vmatmul.msk.f32.vlgmr.msrb.gmra.mxu3 %vm1226_vm4, %v1297_v45  ;;  %1566 = vmatpush.msrb.mxu1 %v1553_v32  ;;  %v1537_v45 = vld [vmem:[#allocation9 + $0x8] sm:$0xff] }
 0x234   : > { %1958 = vmatmul.msk.f32.vlgmr.msra.gmra.mxu2 %vm1226_vm4, %v1367_v46  ;;  %v1332_v47 = vld [vmem:[#allocation2 + $0x3] sm:$0xff] }
 0x235   : > { %1567 = vmatpush.msrb.mxu1 %v1552_v33  ;;  %v1548_v44 = vld [vmem:[#allocation9 + $0x50] sm:$0xff]  ;;  %v1547_v46 = vld [vmem:[#allocation9 + $0x48] sm:$0xff]  ;;  %1595 = vmatpush.msrb.mxu2 %v1537_v45 }
 0x237   : > { %1568 = vmatpush.msrb.mxu1 %v1551_v35 }
 0x239   : > { %1569 = vmatpush.msrb.mxu1 %v1550_v37  ;;  %v1669_v37 = vld [vmem:[%s2879_s10] sm:$0x1] }
 0x23a   : > { %1948 = vmatmul.msk.f32.vlgmr.msra.gmra.mxu1 %vm1226_vm4, %v1332_v47  ;;  %v1536_v47 = vld [vmem:[#allocation9] sm:$0xff] }
 0x23b   : > { %1570 = vmatpush.msrb.mxu1 %v1549_v43  ;;  %1596 = vmatpush.msrb.mxu2 %v1536_v47  ;;  %v1713_v43 = vld [vmem:[%s2882_s13] sm:$0xff] }
 0x23d   : > { %1571 = vmatpush.msrb.mxu1 %v1548_v44  ;;  %v1687_v44 = vld [vmem:[%s2881_s12] sm:$0x1] }
 0x23f   : > { %1572 = vmatpush.msrb.mxu1 %v1547_v46 }
 0x2a7   : > { %v1294_v49 = vpop.f32.mrf.mxu0 }
 0x2af   : > { %v1271_v48 = vpop.f32.mrf.mxu1 }
 0x2b0   : > { %v1295_v50 = vadd.f32 %v1294_v49, %v1271_v48  ;;  %v1644_v48 = vld [vmem:[#allocation9 + $0xf8] sm:$0xff]  ;;  %v1643_v49 = vld [vmem:[#allocation9 + $0xf0] sm:$0xff] }
 0x2b1   : > { %1656 = vmatpush.msra.mxu2 %v1644_v48  ;;  %v1724_v48 = vld [vmem:[%s2910_s20] sm:$0x1] }
 0x2b3   : > { %1657 = vmatpush.msra.mxu2 %v1643_v49 }
 0x2b6   : > { %v1328_v51 = vpop.f32.mrf.mxu3 }
 0x2b7   : > { %v1331_v52 = vadd.f32 %v1328_v51, %v1295_v50  ;;  %v1363_v53 = vpop.f32.mrf.mxu1  ;;  %v1398_v56 = vpop.f32.mrf.mxu2  ;;  %v1546_v50 = vld [vmem:[#allocation9 + $0x40] sm:$0xff]  ;;  %v1610_v51 = vld [vmem:[#allocation9 + $0xb8] sm:$0xff] }
 0x2b8   : > { %1573 = vmatpush.msrb.mxu1 %v1546_v50 }
 0x2b9   : > { %v1366_v54 = vadd.f32 %v1363_v53, %v1331_v52  ;;  %v1609_v52 = vld [vmem:[#allocation9 + $0xb0] sm:$0xff]  ;;  %v1642_v53 = vld [vmem:[#allocation9 + $0xe8] sm:$0xff] }
 0x2ba   : > { %1622 = vmatpush.msra.mxu1 %v1610_v51  ;;  %1658 = vmatpush.msra.mxu2 %v1642_v53 }
 0x2bb   : > { %v1401_v57 = vadd.f32 %v1398_v56, %v1366_v54  ;;  %v1641_v54 = vld [vmem:[#allocation9 + $0xe0] sm:$0xff] }
 0x2bc   : > { %1623 = vmatpush.msra.mxu1 %v1609_v52  ;;  %v1607_v56 = vld [vmem:[#allocation9 + $0xa0] sm:$0xff]  ;;  %1659 = vmatpush.msra.mxu2 %v1641_v54 }
 0x2bd   : > { %v1406_v58 = vadd.f32 %v2069_v55, %v1401_v57  ;;  %v1608_v55 = vld [vmem:[#allocation9 + $0xa8] sm:$0xff]  ;;  %v1640_v57 = vld [vmem:[#allocation9 + $0xd8] sm:$0xff] }
 0x2be   : > { %1624 = vmatpush.msra.mxu1 %v1608_v55  ;;  %1660 = vmatpush.msra.mxu2 %v1640_v57 }
 0x2bf   : > { %v1407_v59 = vmax.f32 %v1406_v58, 0.0  ;;  %v1606_v58 = vld [vmem:[#allocation9 + $0x98] sm:$0xff] }
 0x2c0   : > { %1625 = vmatpush.msra.mxu1 %v1607_v56 }
 0x2c1   : > { %1428 = vmatpush.msrb.mxu0 %v1407_v59  ;;  %1453 = vmatpush.msra.mxu3 %v1407_v59  ;;  %v1639_v59 = vld [vmem:[#allocation9 + $0xd0] sm:$0xff] }
 0x2c2   : > { %1961 = vmatmul.msk.f32.vlgmr.msra.gmra.mxu3 %vm1409_vm6, %v1960_v60  ;;  %1959 = vmatmul.msk.f32.vlgmr.msrb.gmra.mxu0 %vm1409_vm6, %v1408_v61  ;;  %v1605_v60 = vld [vmem:[#allocation9 + $0x90] sm:$0xff]  ;;  %v1638_v61 = vld [vmem:[#allocation9 + $0xc8] sm:$0xff] }
 0x2c3   : > { %1512 = vmatpush.msrb.mxu3 %v1977_v62  ;;  %1475 = vmatpush.msra.mxu0 %v1474_v63  ;;  %v1637_v62 = vld [vmem:[#allocation9 + $0xc0] sm:$0xff]  ;;  %v1604_v63 = vld [vmem:[#allocation9 + $0x88] sm:$0xff] }
 0x2c4   : > { %1626 = vmatpush.msra.mxu1 %v1606_v58  ;;  %1661 = vmatpush.msra.mxu2 %v1639_v59 }
 0x2c5   : > { %1513 = vmatpush.msrb.mxu3 %v1976_v0  ;;  %1476 = vmatpush.msra.mxu0 %v1473_v1  ;;  %v1603_v0 = vld [vmem:[#allocation9 + $0x80] sm:$0xff] }
 0x2c6   : > { %1627 = vmatpush.msra.mxu1 %v1605_v60  ;;  %1662 = vmatpush.msra.mxu2 %v1638_v61  ;;  %v1686_v1 = vld [vmem:[%s2880_s11 + $0x70] sm:$0xff] }
 0x2c7   : > { %1514 = vmatpush.msrb.mxu3 %v1975_v2  ;;  %1477 = vmatpush.msra.mxu0 %v1472_v3  ;;  %v1685_v2 = vld [vmem:[%s2880_s11 + $0x68] sm:$0xff]  ;;  %v1684_v3 = vld [vmem:[%s2880_s11 + $0x60] sm:$0xff] }
 0x2c8   : > { %1628 = vmatpush.msra.mxu1 %v1604_v63  ;;  %1663 = vmatpush.msra.mxu2 %v1637_v62 }
 0x2c9   : > { %1515 = vmatpush.msrb.mxu3 %v1974_v4  ;;  %1478 = vmatpush.msra.mxu0 %v1471_v5  ;;  %v1683_v4 = vld [vmem:[%s2880_s11 + $0x58] sm:$0xff]  ;;  %v1682_v5 = vld [vmem:[%s2880_s11 + $0x50] sm:$0xff] }
 0x2ca   : > { %1629 = vmatpush.msra.mxu1 %v1603_v0 }
 0x2cb   : > { %1516 = vmatpush.msrb.mxu3 %v1973_v6  ;;  %1479 = vmatpush.msra.mxu0 %v1470_v7  ;;  %v1681_v6 = vld [vmem:[%s2880_s11 + $0x48] sm:$0xff] }
 0x2cd   : > { %1517 = vmatpush.msrb.mxu3 %v1972_v8  ;;  %1480 = vmatpush.msra.mxu0 %v1469_v9 }
 0x2cf   : > { %1518 = vmatpush.msrb.mxu3 %v1971_v10  ;;  %1481 = vmatpush.msra.mxu0 %v1468_v11 }
 0x2d1   : > { %1519 = vmatpush.msrb.mxu3 %v1970_v12  ;;  %1482 = vmatpush.msra.mxu0 %v1467_v13 }
 0x2d3   : > { %1520 = vmatpush.msrb.mxu3 %v1969_v14  ;;  %1483 = vmatpush.msra.mxu0 %v1466_v15  ;;  %v1680_v14 = vld [vmem:[%s2880_s11 + $0x40] sm:$0xff]  ;;  %v1679_v15 = vld [vmem:[%s2880_s11 + $0x38] sm:$0xff] }
 0x2d5   : > { %1521 = vmatpush.msrb.mxu3 %v1968_v16  ;;  %1484 = vmatpush.msra.mxu0 %v1465_v17  ;;  %v1678_v16 = vld [vmem:[%s2880_s11 + $0x30] sm:$0xff]  ;;  %v1677_v17 = vld [vmem:[%s2880_s11 + $0x28] sm:$0xff] }
 0x2d7   : > { %1522 = vmatpush.msrb.mxu3 %v1967_v18  ;;  %1485 = vmatpush.msra.mxu0 %v1464_v19  ;;  %v1676_v18 = vld [vmem:[%s2880_s11 + $0x20] sm:$0xff]  ;;  %v1675_v19 = vld [vmem:[%s2880_s11 + $0x18] sm:$0xff] }
 0x2d9   : > { %1523 = vmatpush.msrb.mxu3 %v1966_v20  ;;  %1486 = vmatpush.msra.mxu0 %v1463_v23  ;;  %v1674_v20 = vld [vmem:[%s2880_s11 + $0x10] sm:$0xff] }
 0x2da   : > { %v1723_v23 = vld [vmem:[%s2882_s13 + $0x50] sm:$0xf] }
 0x2db   : > { %1524 = vmatpush.msrb.mxu3 %v1965_v21  ;;  %1487 = vmatpush.msra.mxu0 %v1462_v24  ;;  %v1673_v21 = vld [vmem:[%s2880_s11 + $0x8] sm:$0xff] }
 0x2dc   : > { %v1722_v24 = vld [vmem:[%s2882_s13 + $0x48] sm:$0xff] }
 0x2dd   : > { %1525 = vmatpush.msrb.mxu3 %v1964_v22  ;;  %1488 = vmatpush.msra.mxu0 %v1461_v25  ;;  %v1672_v22 = vld [vmem:[%s2880_s11] sm:$0xff] }
 0x2de   : > { %v1721_v25 = vld [vmem:[%s2882_s13 + $0x40] sm:$0xff] }
 0x2df   : > { %1526 = vmatpush.msrb.mxu3 %v1963_v26  ;;  %1489 = vmatpush.msra.mxu0 %v1460_v27  ;;  %v1720_v26 = vld [vmem:[%s2882_s13 + $0x38] sm:$0xff]  ;;  %v1719_v27 = vld [vmem:[%s2882_s13 + $0x30] sm:$0xff] }
 0x2e1   : > { %1527 = vmatpush.msrb.mxu3 %v1962_v28  ;;  %1490 = vmatpush.msra.mxu0 %v1459_v29  ;;  %v1718_v28 = vld [vmem:[%s2882_s13 + $0x28] sm:$0xff]  ;;  %v1717_v29 = vld [vmem:[%s2882_s13 + $0x20] sm:$0xff] }
 0x2e3   : > { %1693 = vmatpush.msrb.mxu0 %v1686_v1  ;;  %1983 = vmatpush.msk.msra.mxu3 %vm575_vm0, %v1723_v23 }
 0x2e5   : > { %1694 = vmatpush.msrb.mxu0 %v1685_v2  ;;  %1738 = vmatpush.msra.mxu3 %v1722_v24 }
 0x2e7   : > { %1695 = vmatpush.msrb.mxu0 %v1684_v3  ;;  %1739 = vmatpush.msra.mxu3 %v1721_v25 }
 0x2e9   : > { %1696 = vmatpush.msrb.mxu0 %v1683_v4  ;;  %1740 = vmatpush.msra.mxu3 %v1720_v26 }
 0x2eb   : > { %1697 = vmatpush.msrb.mxu0 %v1682_v5  ;;  %1741 = vmatpush.msra.mxu3 %v1719_v27 }
 0x2ed   : > { %1698 = vmatpush.msrb.mxu0 %v1681_v6  ;;  %1742 = vmatpush.msra.mxu3 %v1718_v28 }
 0x2ef   : > { %1699 = vmatpush.msrb.mxu0 %v1680_v14  ;;  %1743 = vmatpush.msra.mxu3 %v1717_v29 }
 0x2f1   : > { %1700 = vmatpush.msrb.mxu0 %v1679_v15  ;;  %1744 = vmatpush.msra.mxu3 %v1716_v31 }
 0x2f3   : > { %1701 = vmatpush.msrb.mxu0 %v1678_v16 }
 0x2f5   : > { %1702 = vmatpush.msrb.mxu0 %v1677_v17 }
 0x2f7   : > { %1703 = vmatpush.msrb.mxu0 %v1676_v18 }
 0x2f9   : > { %1704 = vmatpush.msrb.mxu0 %v1675_v19 }
 0x2fb   : > { %1705 = vmatpush.msrb.mxu0 %v1674_v20 }
 0x2fd   : > { %1706 = vmatpush.msrb.mxu0 %v1673_v21 }
 0x2ff   : > { %1707 = vmatpush.msrb.mxu0 %v1672_v22 }
 0x33f   : > { %v1430_v40 = vpop.f32.mrf.mxu0 }
 0x345   : > { %v1455_v41 = vpop.f32.mrf.mxu3 }
 0x346   : > { %v1458_v42 = vmax.f32 %v1430_v40, %v1455_v41  ;;  %v1715_v41 = vld [vmem:[%s2882_s13 + $0x10] sm:$0xff] }
 0x347   : > { %1745 = vmatpush.msra.mxu3 %v1715_v41 }
 0x348   : > { %1528 = vmatmul.f32.vlgmr.msrb.gmra.mxu3 %v1458_v42  ;;  %1491 = vmatmul.f32.vlgmr.msra.gmra.mxu0 %v1458_v42  ;;  %v1714_v42 = vld [vmem:[%s2882_s13 + $0x8] sm:$0xff] }
 0x349   : > { %1746 = vmatpush.msra.mxu3 %v1714_v42 }
 0x34b   : > { %1747 = vmatpush.msra.mxu3 %v1713_v43 }
 0x3c5   : > { %v1492_v7 = vpop.f32.mrf.mxu0 }
 0x3cb   : > { %v1529_v8 = vpop.f32.mrf.mxu3 }
 0x3cc   : > { %v1532_v9 = vmax.f32 %v1492_v7, %v1529_v8 }
 0x3ce   : > { %1534 = vst.msk [vmem:[#allocation3] sm:$0xf] %vm1533_vm7, %v1532_v9 }
 0x3d5   : > { %v1535_v10 = vld [vmem:[#allocation3] sm:$0x1]  ;;  %v1544_v11 = vld [vmem:[#allocation3 + $0x1] sm:$0x1]  ;;  %v1635_v12 = vld [vmem:[#allocation3 + $0x3] sm:$0x1] }
 0x3d6   : > { %1979 = vmatmul.msk.f32.vlgmr.msrb.gmra.mxu2 %vm1554_vm8, %v1535_v10  ;;  %1978 = vmatmul.msk.f32.vlgmr.msrb.gmra.mxu1 %vm1554_vm8, %v1544_v11  ;;  %v1601_v13 = vld [vmem:[#allocation3 + $0x2] sm:$0x1] }
 0x3de   : > { %1981 = vmatmul.msk.f32.vlgmr.msra.gmra.mxu2 %vm1554_vm8, %v1635_v12  ;;  %1980 = vmatmul.msk.f32.vlgmr.msra.gmra.mxu1 %vm1554_vm8, %v1601_v13 }
 0x453   : > { %v1575_v30 = vpop.f32.mrf.mxu1 }
 0x459   : > { %v1598_v32 = vpop.f32.mrf.mxu2 }
 0x45a   : > { %v1599_v33 = vadd.f32 %v1598_v32, %v1575_v30 }
 0x45b   : > { %v1631_v34 = vpop.f32.mrf.mxu1 }
 0x45c   : > { %v1634_v35 = vadd.f32 %v1631_v34, %v1599_v33 }
 0x461   : > { %v1665_v36 = vpop.f32.mrf.mxu2 }
 0x462   : > { %v1668_v38 = vadd.f32 %v1665_v36, %v1634_v35 }
 0x464   : > { %v1670_v39 = vadd.f32 %v1669_v37, %v1668_v38 }
 0x466   : > { %v1671_v40 = vmax.f32 %v1670_v39, 0.0 }
 0x468   : > { %1982 = vmatmul.msk.f32.vlgmr.msrb.gmra.mxu0 %vm1688_vm9, %v1671_v40 }
 0x4e5   : > { %v1709_v45 = vpop.f32.mrf.mxu0 }
 0x4e6   : > { %v1710_v46 = vadd.f32 %v1709_v45, %v1687_v44 }
 0x4e8   : > { %v1712_v47 = vmax.f32 %v1710_v46, 0.0 }
 0x4ea   : > { %1984 = vmatmul.msk.f32.vlgmr.msra.gmra.mxu3 %vm1725_vm10, %v1712_v47 }
 0x56d   : > { %v1749_v49 = vpop.f32.mrf.mxu3 }
 0x56e   : > { %v1750_v50 = vadd.f32 %v1749_v49, %v1724_v48 }
 0x570   : > { %1752 = vst [vmem:[%s536_s24] sm:$0x1] %v1750_v50 }
 0x571   : > { %2187 = shalt.err (!%p2184_p8)
}
 0x572   : > { %2007 = dma.vmem_to_hbm [thread:$0]  (%p2357_p5), %s1765_s4, 16, %s1767_s1, %s1754_s14  }
 0x573 PF: > { %s2911_s29 = sld [smem:[#allocation16_spill]] }
 0x574   : > { %s2912_s16 = sld [smem:[#allocation14_spill]] }
 0x579   : > { %p2029_p9 = scmp.ge.s32.totalorder %s2911_s29, 2 }
 0x57a   : > { %s1778_s25 = sand.u32 1, %s2912_s16  }
 0x57b   : > { %p2020_p10 = pnand %p2029_p9, %p2361_p6  ;;  %s1779_s20 = scalar_lea.sflag [#allocation6], %s1778_s25 }
 0x57d   : > { %p2021_p11 = pneg %p2020_p10 }
 0x57f   : > { %2213 = dma.done.wait (%p2021_p11), %s1779_s20, 16  }
 0x580   : > { %2215 = vsyncadd (%p2021_p11), %s1779_s20, 4294967280  ;;  %s2914_s21 = sld [smem:[#allocation17_spill]]  ;;  %s2917_s18 = smov %s2222_s19 }
 0x581   : > { %s2915_s24 = sld [smem:[#allocation15_spill]] }
 0x582   : > { %s2916_s20 = sld [smem:[#allocation18_spill]] }
 0x586   : > { %p27_p12 = scmp.ge.s32.totalorder %s2914_s21, 4  }
 0x587   : > { %s2918_s19 = smov %s2915_s24 }
 0x588   :  { %29 = sbr.rel (!%p27_p12) target bundleno = 9 (0x9), region = 143 }
 0x58d   :  { %1784 = vsyncpa [#allocation5], 1 }
 0x58e   :  { %1786 = vsyncpa [#allocation5 + $0x1], 1 }
 0x58f   :  { %1787 = vsyncpa [#allocation8], 1 }
 0x590   :  { %1788 = vsyncpa [#allocation6], 1 }
 0x591   :  { %1790 = vsyncpa [#allocation6 + $0x1], 1 }

</bundles_post_ra>
